<compile_context>
chip_gen: v5e
topology: v5e:2x2
jax: 0.10.0
libtpu: 0.0.40
codegen_flags: <defaults>
</compile_context>

<pallas_src>
import math

import jax
import jax.numpy as jnp
from jax.experimental import pallas as pl
from jax.experimental.pallas import tpu as pltpu

LANE = 128  # TPU lane width; padding target for gate / output dims


def _round_up(n, m):
    return ((n + m - 1) // m) * m


# ----------------------------------------------------------------------------
# Fused Pallas kernel: all GRU layers + FC head in a single grid step.
# ----------------------------------------------------------------------------
def _make_fused_gru_kernel(seq, batch, hw, gw, num_layers):
    """hw: stored hidden width (== H when 3*H <= 128, else H padded to 128).
    gw: gate-block width (multiple of 128, >= 3*hw).
    Gate g occupies columns [g*hw, (g+1)*hw) of every gate-shaped array."""

    def kernel(*refs):
        x_ref = refs[0]
        layer_refs = refs[1:1 + 4 * num_layers]
        wfc_ref = refs[1 + 4 * num_layers]
        bfc_ref = refs[2 + 4 * num_layers]
        out_ref = refs[3 + 4 * num_layers]
        hseq_ref = refs[4 + 4 * num_layers]    # VMEM (seq*batch, hw)
        gates_ref = refs[5 + 4 * num_layers]   # VMEM (seq*batch, gw)

        for layer in range(num_layers):
            wih_ref, whh_ref, bih_ref, bhhn_ref = \
                layer_refs[4 * layer:4 * layer + 4]
            xin = x_ref[...] if layer == 0 else hseq_ref[...]

            # ---- Pass 1: single batched input projection over the whole
            #      (seq*batch) slab.  b_ih (+ folded r/z parts of b_hh) added
            #      once. -------------------------------------------------------
            gates_ref[...] = (
                jnp.dot(xin, wih_ref[...], preferred_element_type=jnp.float32)
                + bih_ref[...])

            # ---- Pass 2: sequential recurrence (PyTorch gate order r,z,n).
            #      whh and the n-gate bias are hoisted out of the serial loop.
            whh = whh_ref[...]                                   # (hw, gw)
            bhh_n = jnp.broadcast_to(bhhn_ref[...], (batch, hw))  # hoisted bcast
            h = jnp.zeros((batch, hw), jnp.float32)
            for t in range(seq):      # static unroll; re-roll/chunk if seq grows
                row = t * batch
                gi = gates_ref[pl.ds(row, batch), :]             # (batch, gw)
                gh = jnp.dot(h, whh, preferred_element_type=jnp.float32)
                r = jax.nn.sigmoid(gi[:, 0:hw] + gh[:, 0:hw])
                z = jax.nn.sigmoid(gi[:, hw:2 * hw] + gh[:, hw:2 * hw])
                n = jnp.tanh(gi[:, 2 * hw:3 * hw]
                             + r * (gh[:, 2 * hw:3 * hw] + bhh_n))
                h = n + z * (h - n)              # == (1 - z) * n + z * h
                hseq_ref[pl.ds(row, batch), :] = h

        # ---- FC head: one matmul, dense lane-full (seq*batch, Op) store. -----
        out_ref[...] = (
            jnp.dot(hseq_ref[...], wfc_ref[...],
                    preferred_element_type=jnp.float32)
            + bfc_ref[...])

    return kernel


# ----------------------------------------------------------------------------
# Wrapper
# ----------------------------------------------------------------------------
def gru_forward(x_dict, packed_params, w_fc_p, b_fc_p, output_size):
    """Mirrors GRU.forward: view -> nn.GRU (num_layers) -> fc -> unsqueeze(2)."""
    flow_x = x_dict["train_x"]
    seq, batch = flow_x.shape[0], flow_x.shape[1]
    x2d = (flow_x.reshape(seq, batch, -1)
                 .reshape(seq * batch, -1)
                 .astype(jnp.float32))
    num_layers = len(packed_params)
    hw = packed_params[0][1].shape[0]            # whh_p is (hw, gw)
    gw = packed_params[0][1].shape[1]
    out_p = w_fc_p.shape[1]

    in_specs = [pl.BlockSpec(x2d.shape, lambda i: (0, 0))]
    inputs = [x2d]
    for layer_params in packed_params:
        for arr in layer_params:
            in_specs.append(pl.BlockSpec(arr.shape, lambda i: (0, 0)))
            inputs.append(arr)
    for arr in (w_fc_p, b_fc_p):
        in_specs.append(pl.BlockSpec(arr.shape, lambda i: (0, 0)))
        inputs.append(arr)

    out_pad = pl.pallas_call(
        _make_fused_gru_kernel(seq, batch, hw, gw, num_layers),
        out_shape=jax.ShapeDtypeStruct((seq * batch, out_p), jnp.float32),
        grid_spec=pltpu.PrefetchScalarGridSpec(
            num_scalar_prefetch=0,
            grid=(1,),
            in_specs=in_specs,
            out_specs=pl.BlockSpec((seq * batch, out_p), lambda i: (0, 0)),
            scratch_shapes=[
                pltpu.VMEM((seq * batch, hw), jnp.float32),
                pltpu.VMEM((seq * batch, gw), jnp.float32),
            ],
        ),
        compiler_params=pltpu.CompilerParams(
            dimension_semantics=("arbitrary",),        # single sequential step
            vmem_limit_bytes=32 * 1024 * 1024,         # explicit scaling guard
        ),
    )(*inputs)

    out = out_pad.reshape(seq, batch, out_p)[:, :, :output_size]
    return out[:, :, None, :]                    # unsqueeze(2)


# ----------------------------------------------------------------------------
# Parameter init (PyTorch layout) + packing into kernel layout
# ----------------------------------------------------------------------------
def init_gru_params(key, input_size, hidden_size, num_layers, output_size):
    """PyTorch-style params: W_ih (3H,in), W_hh (3H,H), biases (3H,); fc (O,H),(O,)."""
    k = 1.0 / math.sqrt(hidden_size)
    params = []
    for layer in range(num_layers):
        in_dim = input_size if layer == 0 else hidden_size
        key, k1, k2, k3, k4 = jax.random.split(key, 5)
        w_ih = jax.random.uniform(k1, (3 * hidden_size, in_dim), jnp.float32, -k, k)
        w_hh = jax.random.uniform(k2, (3 * hidden_size, hidden_size), jnp.float32, -k, k)
        b_ih = jax.random.uniform(k3, (3 * hidden_size,), jnp.float32, -k, k)
        b_hh = jax.random.uniform(k4, (3 * hidden_size,), jnp.float32, -k, k)
        params.append((w_ih, w_hh, b_ih, b_hh))
    key, kf1, kf2 = jax.random.split(key, 3)
    w_fc = jax.random.uniform(kf1, (output_size, hidden_size), jnp.float32, -k, k)
    b_fc = jax.random.uniform(kf2, (output_size,), jnp.float32, -k, k)
    return params, w_fc, b_fc


def pack_params(torch_gru_params, w_fc, b_fc, lane=LANE):
    """Kernel layout: stacked-gate, transposed, compact-packed when 3*H <= 128.

    hw = H (compact) or H padded to 128 (wide); gw = round_up(3*hw, 128).
    Gate g occupies columns [g*hw, g*hw+H).  W_ih -> (in, gw), W_hh -> (hw, gw).
    The r/z-gate parts of b_hh are folded into the projection bias; only the
    n-gate b_hh is kept separately (it sits inside r*(W_hn h + b_hn)).
    Zero padding keeps the math exact."""
    hidden = torch_gru_params[0][1].shape[1]
    hw = hidden if 3 * hidden <= lane else _round_up(hidden, lane)
    gw = _round_up(3 * hw, lane)
    packed = []
    for layer, (w_ih, w_hh, b_ih, b_hh) in enumerate(torch_gru_params):
        in_dim = w_ih.shape[1]
        in_p = in_dim if layer == 0 else hw
        wih_p = jnp.zeros((in_p, gw), jnp.float32)
        whh_p = jnp.zeros((hw, gw), jnp.float32)
        bih_p = jnp.zeros((1, gw), jnp.float32)
        bhhn_p = jnp.zeros((1, hw), jnp.float32)
        for g in range(3):
            rows = slice(g * hidden, (g + 1) * hidden)
            cols = slice(g * hw, g * hw + hidden)
            wih_p = wih_p.at[:in_dim, cols].set(w_ih[rows, :].T)
            whh_p = whh_p.at[:hidden, cols].set(w_hh[rows, :].T)
            b = b_ih[rows]
            if g < 2:                       # fold r/z parts of b_hh
                b = b + b_hh[rows]
            bih_p = bih_p.at[0, cols].set(b)
        bhhn_p = bhhn_p.at[0, :hidden].set(b_hh[2 * hidden:3 * hidden])
        packed.append((wih_p, whh_p, bih_p, bhhn_p))
    out_size = w_fc.shape[0]
    out_p = _round_up(out_size, lane)
    wfc_p = jnp.zeros((hw, out_p), jnp.float32).at[:hidden, :out_size].set(w_fc.T)
    bfc_p = jnp.zeros((1, out_p), jnp.float32).at[0, :out_size].set(b_fc)
    return packed, wfc_p, bfc_p


# ----------------------------------------------------------------------------
# Pure-JAX reference (PyTorch semantics, unpadded) for correctness check
# ----------------------------------------------------------------------------
def gru_forward_ref(x_dict, torch_gru_params, w_fc, b_fc):
    flow_x = x_dict["train_x"]
    xs = flow_x.reshape(flow_x.shape[0], flow_x.shape[1], -1).astype(jnp.float32)
    for (w_ih, w_hh, b_ih, b_hh) in torch_gru_params:
        H = w_hh.shape[1]
        seq, batch, _ = xs.shape
        h = jnp.zeros((batch, H), jnp.float32)
        outs = []
        for t in range(seq):
            gi = xs[t] @ w_ih.T + b_ih
            gh = h @ w_hh.T + b_hh
            r = jax.nn.sigmoid(gi[:, :H] + gh[:, :H])
            z = jax.nn.sigmoid(gi[:, H:2 * H] + gh[:, H:2 * H])
            n = jnp.tanh(gi[:, 2 * H:] + r * gh[:, 2 * H:])
            h = (1.0 - z) * n + z * h
            outs.append(h)
        xs = jnp.stack(outs, axis=0)
    out = xs @ w_fc.T + b_fc
    return out[:, :, None, :]


if __name__ == "__main__":
    # Small shapes: seq=8, batch=2, num_nodes=4, feat=4 -> input_size=16
    seq_len, batch, num_nodes, feat = 8, 2, 4, 4
    input_size = num_nodes * feat
    hidden_size = 32
    num_layers = 2
    output_size = 2

    key = jax.random.PRNGKey(0)
    key, kx = jax.random.split(key)
    train_x = jax.random.normal(kx, (seq_len, batch, num_nodes, feat), jnp.float32)
    x_dict = {"train_x": train_x}

    torch_params, w_fc, b_fc = init_gru_params(
        key, input_size, hidden_size, num_layers, output_size)
    packed_params, w_fc_p, b_fc_p = pack_params(torch_params, w_fc, b_fc)

    out = gru_forward(x_dict, packed_params, w_fc_p, b_fc_p, output_size)
    out = jax.block_until_ready(out)

    ref = gru_forward_ref(x_dict, torch_params, w_fc, b_fc)
    assert out.shape == (seq_len, batch, 1, output_size), out.shape
    err = float(jnp.max(jnp.abs(out - ref)))
    assert err < 1e-3, err

    print("KERNEL_OK")
</pallas_src>

<mosaic_0001>
module attributes {stable_mosaic.version = 11 : i64} {
  func.func @kernel(%arg0: i32, %arg1: memref<16x16xf32, #tpu.memory_space<vmem>>, %arg2: memref<16x128xf32, #tpu.memory_space<vmem>>, %arg3: memref<32x128xf32, #tpu.memory_space<vmem>>, %arg4: memref<1x128xf32, #tpu.memory_space<vmem>>, %arg5: memref<1x32xf32, #tpu.memory_space<vmem>>, %arg6: memref<32x128xf32, #tpu.memory_space<vmem>>, %arg7: memref<32x128xf32, #tpu.memory_space<vmem>>, %arg8: memref<1x128xf32, #tpu.memory_space<vmem>>, %arg9: memref<1x32xf32, #tpu.memory_space<vmem>>, %arg10: memref<32x128xf32, #tpu.memory_space<vmem>>, %arg11: memref<1x128xf32, #tpu.memory_space<vmem>>, %arg12: memref<16x128xf32, #tpu.memory_space<vmem>>, %arg13: memref<16x32xf32, #tpu.memory_space<vmem>>, %arg14: memref<16x128xf32, #tpu.memory_space<vmem>>) attributes {dimension_semantics = [#tpu.dimension_semantics<arbitrary>], iteration_bounds = array<i64: 1>, scalar_prefetch = 0 : i64, scratch_operands = 2 : i64, tpu.core_type = #tpu.core_type<tc>, window_params = [{pipeline_mode = #tpu.pipeline_mode<synchronous>, transform_indices = @transform_0, window_bounds = array<i64: 16, 16>}, {pipeline_mode = #tpu.pipeline_mode<synchronous>, transform_indices = @transform_1, window_bounds = array<i64: 16, 128>}, {pipeline_mode = #tpu.pipeline_mode<synchronous>, transform_indices = @transform_2, window_bounds = array<i64: 32, 128>}, {pipeline_mode = #tpu.pipeline_mode<synchronous>, transform_indices = @transform_3, window_bounds = array<i64: 1, 128>}, {pipeline_mode = #tpu.pipeline_mode<synchronous>, transform_indices = @transform_4, window_bounds = array<i64: 1, 32>}, {pipeline_mode = #tpu.pipeline_mode<synchronous>, transform_indices = @transform_5, window_bounds = array<i64: 32, 128>}, {pipeline_mode = #tpu.pipeline_mode<synchronous>, transform_indices = @transform_6, window_bounds = array<i64: 32, 128>}, {pipeline_mode = #tpu.pipeline_mode<synchronous>, transform_indices = @transform_7, window_bounds = array<i64: 1, 128>}, {pipeline_mode = #tpu.pipeline_mode<synchronous>, transform_indices = @transform_8, window_bounds = array<i64: 1, 32>}, {pipeline_mode = #tpu.pipeline_mode<synchronous>, transform_indices = @transform_9, window_bounds = array<i64: 32, 128>}, {pipeline_mode = #tpu.pipeline_mode<synchronous>, transform_indices = @transform_10, window_bounds = array<i64: 1, 128>}, {pipeline_mode = #tpu.pipeline_mode<synchronous>, transform_indices = @transform_11, window_bounds = array<i64: 16, 128>}]} {
    %c0 = arith.constant 0 : index
    %c0_0 = arith.constant 0 : index
    %0 = vector.load %arg1[%c0, %c0_0] : memref<16x16xf32, #tpu.memory_space<vmem>>, vector<16x16xf32>
    %c0_1 = arith.constant 0 : index
    %c0_2 = arith.constant 0 : index
    %1 = vector.load %arg2[%c0_1, %c0_2] : memref<16x128xf32, #tpu.memory_space<vmem>>, vector<16x128xf32>
    %cst = arith.constant dense<0.000000e+00> : vector<16x128xf32>
    %2 = tpu.matmul %0, %1, %cst {dimension_numbers = #tpu.dot_dimension_numbers<[1], [0], [0], [1], [0, 0, 1, 1], [], []>} : vector<16x16xf32>, vector<16x128xf32>, vector<16x128xf32> -> vector<16x128xf32>
    %c0_3 = arith.constant 0 : index
    %c0_4 = arith.constant 0 : index
    %3 = vector.load %arg4[%c0_3, %c0_4] : memref<1x128xf32, #tpu.memory_space<vmem>>, vector<1x128xf32>
    %4 = vector.broadcast %3 : vector<1x128xf32> to vector<16x128xf32>
    %5 = arith.addf %2, %4 : vector<16x128xf32>
    %c0_5 = arith.constant 0 : index
    %c0_6 = arith.constant 0 : index
    %6 = vector.load %arg14[%c0_5, %c0_6] : memref<16x128xf32, #tpu.memory_space<vmem>>, vector<16x128xf32>
    tpu.vector_store %arg14[%c0_5, %c0_6], %5 {strides = array<i32>} : memref<16x128xf32, #tpu.memory_space<vmem>>, vector<16x128xf32>,
    %c0_7 = arith.constant 0 : index
    %c0_8 = arith.constant 0 : index
    %7 = vector.load %arg3[%c0_7, %c0_8] : memref<32x128xf32, #tpu.memory_space<vmem>>, vector<32x128xf32>
    %c0_9 = arith.constant 0 : index
    %c0_10 = arith.constant 0 : index
    %8 = vector.load %arg5[%c0_9, %c0_10] : memref<1x32xf32, #tpu.memory_space<vmem>>, vector<1x32xf32>
    %9 = vector.shape_cast %8 : vector<1x32xf32> to vector<1x32xf32>
    %10 = vector.broadcast %9 : vector<1x32xf32> to vector<2x32xf32>
    %cst_11 = arith.constant 0.000000e+00 : f32
    %11 = vector.broadcast %cst_11 : f32 to vector<2x32xf32>
    %c0_12 = arith.constant 0 : index
    %c0_13 = arith.constant 0 : index
    %12 = vector.load %arg14[%c0_12, %c0_13] : memref<16x128xf32, #tpu.memory_space<vmem>>, vector<2x128xf32>
    %cst_14 = arith.constant dense<0.000000e+00> : vector<2x128xf32>
    %13 = tpu.matmul %11, %7, %cst_14 {dimension_numbers = #tpu.dot_dimension_numbers<[1], [0], [0], [1], [0, 0, 1, 1], [], []>} : vector<2x32xf32>, vector<32x128xf32>, vector<2x128xf32> -> vector<2x128xf32>
    %14 = vector.extract_strided_slice %12 {offsets = [0, 0], sizes = [2, 32], strides = [1, 1]} : vector<2x128xf32> to vector<2x32xf32>
    %15 = vector.extract_strided_slice %13 {offsets = [0, 0], sizes = [2, 32], strides = [1, 1]} : vector<2x128xf32> to vector<2x32xf32>
    %16 = arith.addf %14, %15 : vector<2x32xf32>
    %17 = arith.negf %16 : vector<2x32xf32>
    %18 = math.exp %17 : vector<2x32xf32>
    %cst_15 = arith.constant 1.000000e+00 : f32
    %19 = vector.broadcast %cst_15 : f32 to vector<2x32xf32>
    %20 = arith.addf %19, %18 : vector<2x32xf32>
    %21 = arith.divf %19, %20 : vector<2x32xf32>
    %22 = vector.extract_strided_slice %12 {offsets = [0, 32], sizes = [2, 32], strides = [1, 1]} : vector<2x128xf32> to vector<2x32xf32>
    %23 = vector.extract_strided_slice %13 {offsets = [0, 32], sizes = [2, 32], strides = [1, 1]} : vector<2x128xf32> to vector<2x32xf32>
    %24 = arith.addf %22, %23 : vector<2x32xf32>
    %25 = arith.negf %24 : vector<2x32xf32>
    %26 = math.exp %25 : vector<2x32xf32>
    %cst_16 = arith.constant 1.000000e+00 : f32
    %27 = vector.broadcast %cst_16 : f32 to vector<2x32xf32>
    %28 = arith.addf %27, %26 : vector<2x32xf32>
    %29 = arith.divf %27, %28 : vector<2x32xf32>
    %30 = vector.extract_strided_slice %12 {offsets = [0, 64], sizes = [2, 32], strides = [1, 1]} : vector<2x128xf32> to vector<2x32xf32>
    %31 = vector.extract_strided_slice %13 {offsets = [0, 64], sizes = [2, 32], strides = [1, 1]} : vector<2x128xf32> to vector<2x32xf32>
    %32 = arith.addf %31, %10 : vector<2x32xf32>
    %33 = arith.mulf %21, %32 : vector<2x32xf32>
    %34 = arith.addf %30, %33 : vector<2x32xf32>
    %35 = math.tanh %34 : vector<2x32xf32>
    %36 = arith.subf %11, %35 : vector<2x32xf32>
    %37 = arith.mulf %29, %36 : vector<2x32xf32>
    %38 = arith.addf %35, %37 : vector<2x32xf32>
    %c0_17 = arith.constant 0 : index
    %c0_18 = arith.constant 0 : index
    %39 = vector.load %arg13[%c0_17, %c0_18] : memref<16x32xf32, #tpu.memory_space<vmem>>, vector<2x32xf32>
    tpu.vector_store %arg13[%c0_17, %c0_18], %38 {strides = array<i32>} : memref<16x32xf32, #tpu.memory_space<vmem>>, vector<2x32xf32>,
    %c2 = arith.constant 2 : index
    %c0_19 = arith.constant 0 : index
    %40 = vector.load %arg14[%c2, %c0_19] : memref<16x128xf32, #tpu.memory_space<vmem>>, vector<2x128xf32>
    %cst_20 = arith.constant dense<0.000000e+00> : vector<2x128xf32>
    %41 = tpu.matmul %38, %7, %cst_20 {dimension_numbers = #tpu.dot_dimension_numbers<[1], [0], [0], [1], [0, 0, 1, 1], [], []>} : vector<2x32xf32>, vector<32x128xf32>, vector<2x128xf32> -> vector<2x128xf32>
    %42 = vector.extract_strided_slice %40 {offsets = [0, 0], sizes = [2, 32], strides = [1, 1]} : vector<2x128xf32> to vector<2x32xf32>
    %43 = vector.extract_strided_slice %41 {offsets = [0, 0], sizes = [2, 32], strides = [1, 1]} : vector<2x128xf32> to vector<2x32xf32>
    %44 = arith.addf %42, %43 : vector<2x32xf32>
    %45 = arith.negf %44 : vector<2x32xf32>
    %46 = math.exp %45 : vector<2x32xf32>
    %cst_21 = arith.constant 1.000000e+00 : f32
    %47 = vector.broadcast %cst_21 : f32 to vector<2x32xf32>
    %48 = arith.addf %47, %46 : vector<2x32xf32>
    %49 = arith.divf %47, %48 : vector<2x32xf32>
    %50 = vector.extract_strided_slice %40 {offsets = [0, 32], sizes = [2, 32], strides = [1, 1]} : vector<2x128xf32> to vector<2x32xf32>
    %51 = vector.extract_strided_slice %41 {offsets = [0, 32], sizes = [2, 32], strides = [1, 1]} : vector<2x128xf32> to vector<2x32xf32>
    %52 = arith.addf %50, %51 : vector<2x32xf32>
    %53 = arith.negf %52 : vector<2x32xf32>
    %54 = math.exp %53 : vector<2x32xf32>
    %cst_22 = arith.constant 1.000000e+00 : f32
    %55 = vector.broadcast %cst_22 : f32 to vector<2x32xf32>
    %56 = arith.addf %55, %54 : vector<2x32xf32>
    %57 = arith.divf %55, %56 : vector<2x32xf32>
    %58 = vector.extract_strided_slice %40 {offsets = [0, 64], sizes = [2, 32], strides = [1, 1]} : vector<2x128xf32> to vector<2x32xf32>
    %59 = vector.extract_strided_slice %41 {offsets = [0, 64], sizes = [2, 32], strides = [1, 1]} : vector<2x128xf32> to vector<2x32xf32>
    %60 = arith.addf %59, %10 : vector<2x32xf32>
    %61 = arith.mulf %49, %60 : vector<2x32xf32>
    %62 = arith.addf %58, %61 : vector<2x32xf32>
    %63 = math.tanh %62 : vector<2x32xf32>
    %64 = arith.subf %38, %63 : vector<2x32xf32>
    %65 = arith.mulf %57, %64 : vector<2x32xf32>
    %66 = arith.addf %63, %65 : vector<2x32xf32>
    %c2_23 = arith.constant 2 : index
    %c0_24 = arith.constant 0 : index
    %67 = vector.load %arg13[%c2_23, %c0_24] : memref<16x32xf32, #tpu.memory_space<vmem>>, vector<2x32xf32>
    tpu.vector_store %arg13[%c2_23, %c0_24], %66 {strides = array<i32>} : memref<16x32xf32, #tpu.memory_space<vmem>>, vector<2x32xf32>,
    %c4 = arith.constant 4 : index
    %c0_25 = arith.constant 0 : index
    %68 = vector.load %arg14[%c4, %c0_25] : memref<16x128xf32, #tpu.memory_space<vmem>>, vector<2x128xf32>
    %cst_26 = arith.constant dense<0.000000e+00> : vector<2x128xf32>
    %69 = tpu.matmul %66, %7, %cst_26 {dimension_numbers = #tpu.dot_dimension_numbers<[1], [0], [0], [1], [0, 0, 1, 1], [], []>} : vector<2x32xf32>, vector<32x128xf32>, vector<2x128xf32> -> vector<2x128xf32>
    %70 = vector.extract_strided_slice %68 {offsets = [0, 0], sizes = [2, 32], strides = [1, 1]} : vector<2x128xf32> to vector<2x32xf32>
    %71 = vector.extract_strided_slice %69 {offsets = [0, 0], sizes = [2, 32], strides = [1, 1]} : vector<2x128xf32> to vector<2x32xf32>
    %72 = arith.addf %70, %71 : vector<2x32xf32>
    %73 = arith.negf %72 : vector<2x32xf32>
    %74 = math.exp %73 : vector<2x32xf32>
    %cst_27 = arith.constant 1.000000e+00 : f32
    %75 = vector.broadcast %cst_27 : f32 to vector<2x32xf32>
    %76 = arith.addf %75, %74 : vector<2x32xf32>
    %77 = arith.divf %75, %76 : vector<2x32xf32>
    %78 = vector.extract_strided_slice %68 {offsets = [0, 32], sizes = [2, 32], strides = [1, 1]} : vector<2x128xf32> to vector<2x32xf32>
    %79 = vector.extract_strided_slice %69 {offsets = [0, 32], sizes = [2, 32], strides = [1, 1]} : vector<2x128xf32> to vector<2x32xf32>
    %80 = arith.addf %78, %79 : vector<2x32xf32>
    %81 = arith.negf %80 : vector<2x32xf32>
    %82 = math.exp %81 : vector<2x32xf32>
    %cst_28 = arith.constant 1.000000e+00 : f32
    %83 = vector.broadcast %cst_28 : f32 to vector<2x32xf32>
    %84 = arith.addf %83, %82 : vector<2x32xf32>
    %85 = arith.divf %83, %84 : vector<2x32xf32>
    %86 = vector.extract_strided_slice %68 {offsets = [0, 64], sizes = [2, 32], strides = [1, 1]} : vector<2x128xf32> to vector<2x32xf32>
    %87 = vector.extract_strided_slice %69 {offsets = [0, 64], sizes = [2, 32], strides = [1, 1]} : vector<2x128xf32> to vector<2x32xf32>
    %88 = arith.addf %87, %10 : vector<2x32xf32>
    %89 = arith.mulf %77, %88 : vector<2x32xf32>
    %90 = arith.addf %86, %89 : vector<2x32xf32>
    %91 = math.tanh %90 : vector<2x32xf32>
    %92 = arith.subf %66, %91 : vector<2x32xf32>
    %93 = arith.mulf %85, %92 : vector<2x32xf32>
    %94 = arith.addf %91, %93 : vector<2x32xf32>
    %c4_29 = arith.constant 4 : index
    %c0_30 = arith.constant 0 : index
    %95 = vector.load %arg13[%c4_29, %c0_30] : memref<16x32xf32, #tpu.memory_space<vmem>>, vector<2x32xf32>
    tpu.vector_store %arg13[%c4_29, %c0_30], %94 {strides = array<i32>} : memref<16x32xf32, #tpu.memory_space<vmem>>, vector<2x32xf32>,
    %c6 = arith.constant 6 : index
    %c0_31 = arith.constant 0 : index
    %96 = vector.load %arg14[%c6, %c0_31] : memref<16x128xf32, #tpu.memory_space<vmem>>, vector<2x128xf32>
    %cst_32 = arith.constant dense<0.000000e+00> : vector<2x128xf32>
    %97 = tpu.matmul %94, %7, %cst_32 {dimension_numbers = #tpu.dot_dimension_numbers<[1], [0], [0], [1], [0, 0, 1, 1], [], []>} : vector<2x32xf32>, vector<32x128xf32>, vector<2x128xf32> -> vector<2x128xf32>
    %98 = vector.extract_strided_slice %96 {offsets = [0, 0], sizes = [2, 32], strides = [1, 1]} : vector<2x128xf32> to vector<2x32xf32>
    %99 = vector.extract_strided_slice %97 {offsets = [0, 0], sizes = [2, 32], strides = [1, 1]} : vector<2x128xf32> to vector<2x32xf32>
    %100 = arith.addf %98, %99 : vector<2x32xf32>
    %101 = arith.negf %100 : vector<2x32xf32>
    %102 = math.exp %101 : vector<2x32xf32>
    %cst_33 = arith.constant 1.000000e+00 : f32
    %103 = vector.broadcast %cst_33 : f32 to vector<2x32xf32>
    %104 = arith.addf %103, %102 : vector<2x32xf32>
    %105 = arith.divf %103, %104 : vector<2x32xf32>
    %106 = vector.extract_strided_slice %96 {offsets = [0, 32], sizes = [2, 32], strides = [1, 1]} : vector<2x128xf32> to vector<2x32xf32>
    %107 = vector.extract_strided_slice %97 {offsets = [0, 32], sizes = [2, 32], strides = [1, 1]} : vector<2x128xf32> to vector<2x32xf32>
    %108 = arith.addf %106, %107 : vector<2x32xf32>
    %109 = arith.negf %108 : vector<2x32xf32>
    %110 = math.exp %109 : vector<2x32xf32>
    %cst_34 = arith.constant 1.000000e+00 : f32
    %111 = vector.broadcast %cst_34 : f32 to vector<2x32xf32>
    %112 = arith.addf %111, %110 : vector<2x32xf32>
    %113 = arith.divf %111, %112 : vector<2x32xf32>
    %114 = vector.extract_strided_slice %96 {offsets = [0, 64], sizes = [2, 32], strides = [1, 1]} : vector<2x128xf32> to vector<2x32xf32>
    %115 = vector.extract_strided_slice %97 {offsets = [0, 64], sizes = [2, 32], strides = [1, 1]} : vector<2x128xf32> to vector<2x32xf32>
    %116 = arith.addf %115, %10 : vector<2x32xf32>
    %117 = arith.mulf %105, %116 : vector<2x32xf32>
    %118 = arith.addf %114, %117 : vector<2x32xf32>
    %119 = math.tanh %118 : vector<2x32xf32>
    %120 = arith.subf %94, %119 : vector<2x32xf32>
    %121 = arith.mulf %113, %120 : vector<2x32xf32>
    %122 = arith.addf %119, %121 : vector<2x32xf32>
    %c6_35 = arith.constant 6 : index
    %c0_36 = arith.constant 0 : index
    %123 = vector.load %arg13[%c6_35, %c0_36] : memref<16x32xf32, #tpu.memory_space<vmem>>, vector<2x32xf32>
    tpu.vector_store %arg13[%c6_35, %c0_36], %122 {strides = array<i32>} : memref<16x32xf32, #tpu.memory_space<vmem>>, vector<2x32xf32>,
    %c8 = arith.constant 8 : index
    %c0_37 = arith.constant 0 : index
    %124 = vector.load %arg14[%c8, %c0_37] : memref<16x128xf32, #tpu.memory_space<vmem>>, vector<2x128xf32>
    %cst_38 = arith.constant dense<0.000000e+00> : vector<2x128xf32>
    %125 = tpu.matmul %122, %7, %cst_38 {dimension_numbers = #tpu.dot_dimension_numbers<[1], [0], [0], [1], [0, 0, 1, 1], [], []>} : vector<2x32xf32>, vector<32x128xf32>, vector<2x128xf32> -> vector<2x128xf32>
    %126 = vector.extract_strided_slice %124 {offsets = [0, 0], sizes = [2, 32], strides = [1, 1]} : vector<2x128xf32> to vector<2x32xf32>
    %127 = vector.extract_strided_slice %125 {offsets = [0, 0], sizes = [2, 32], strides = [1, 1]} : vector<2x128xf32> to vector<2x32xf32>
    %128 = arith.addf %126, %127 : vector<2x32xf32>
    %129 = arith.negf %128 : vector<2x32xf32>
    %130 = math.exp %129 : vector<2x32xf32>
    %cst_39 = arith.constant 1.000000e+00 : f32
    %131 = vector.broadcast %cst_39 : f32 to vector<2x32xf32>
    %132 = arith.addf %131, %130 : vector<2x32xf32>
    %133 = arith.divf %131, %132 : vector<2x32xf32>
    %134 = vector.extract_strided_slice %124 {offsets = [0, 32], sizes = [2, 32], strides = [1, 1]} : vector<2x128xf32> to vector<2x32xf32>
    %135 = vector.extract_strided_slice %125 {offsets = [0, 32], sizes = [2, 32], strides = [1, 1]} : vector<2x128xf32> to vector<2x32xf32>
    %136 = arith.addf %134, %135 : vector<2x32xf32>
    %137 = arith.negf %136 : vector<2x32xf32>
    %138 = math.exp %137 : vector<2x32xf32>
    %cst_40 = arith.constant 1.000000e+00 : f32
    %139 = vector.broadcast %cst_40 : f32 to vector<2x32xf32>
    %140 = arith.addf %139, %138 : vector<2x32xf32>
    %141 = arith.divf %139, %140 : vector<2x32xf32>
    %142 = vector.extract_strided_slice %124 {offsets = [0, 64], sizes = [2, 32], strides = [1, 1]} : vector<2x128xf32> to vector<2x32xf32>
    %143 = vector.extract_strided_slice %125 {offsets = [0, 64], sizes = [2, 32], strides = [1, 1]} : vector<2x128xf32> to vector<2x32xf32>
    %144 = arith.addf %143, %10 : vector<2x32xf32>
    %145 = arith.mulf %133, %144 : vector<2x32xf32>
    %146 = arith.addf %142, %145 : vector<2x32xf32>
    %147 = math.tanh %146 : vector<2x32xf32>
    %148 = arith.subf %122, %147 : vector<2x32xf32>
    %149 = arith.mulf %141, %148 : vector<2x32xf32>
    %150 = arith.addf %147, %149 : vector<2x32xf32>
    %c8_41 = arith.constant 8 : index
    %c0_42 = arith.constant 0 : index
    %151 = vector.load %arg13[%c8_41, %c0_42] : memref<16x32xf32, #tpu.memory_space<vmem>>, vector<2x32xf32>
    tpu.vector_store %arg13[%c8_41, %c0_42], %150 {strides = array<i32>} : memref<16x32xf32, #tpu.memory_space<vmem>>, vector<2x32xf32>,
    %c10 = arith.constant 10 : index
    %c0_43 = arith.constant 0 : index
    %152 = vector.load %arg14[%c10, %c0_43] : memref<16x128xf32, #tpu.memory_space<vmem>>, vector<2x128xf32>
    %cst_44 = arith.constant dense<0.000000e+00> : vector<2x128xf32>
    %153 = tpu.matmul %150, %7, %cst_44 {dimension_numbers = #tpu.dot_dimension_numbers<[1], [0], [0], [1], [0, 0, 1, 1], [], []>} : vector<2x32xf32>, vector<32x128xf32>, vector<2x128xf32> -> vector<2x128xf32>
    %154 = vector.extract_strided_slice %152 {offsets = [0, 0], sizes = [2, 32], strides = [1, 1]} : vector<2x128xf32> to vector<2x32xf32>
    %155 = vector.extract_strided_slice %153 {offsets = [0, 0], sizes = [2, 32], strides = [1, 1]} : vector<2x128xf32> to vector<2x32xf32>
    %156 = arith.addf %154, %155 : vector<2x32xf32>
    %157 = arith.negf %156 : vector<2x32xf32>
    %158 = math.exp %157 : vector<2x32xf32>
    %cst_45 = arith.constant 1.000000e+00 : f32
    %159 = vector.broadcast %cst_45 : f32 to vector<2x32xf32>
    %160 = arith.addf %159, %158 : vector<2x32xf32>
    %161 = arith.divf %159, %160 : vector<2x32xf32>
    %162 = vector.extract_strided_slice %152 {offsets = [0, 32], sizes = [2, 32], strides = [1, 1]} : vector<2x128xf32> to vector<2x32xf32>
    %163 = vector.extract_strided_slice %153 {offsets = [0, 32], sizes = [2, 32], strides = [1, 1]} : vector<2x128xf32> to vector<2x32xf32>
    %164 = arith.addf %162, %163 : vector<2x32xf32>
    %165 = arith.negf %164 : vector<2x32xf32>
    %166 = math.exp %165 : vector<2x32xf32>
    %cst_46 = arith.constant 1.000000e+00 : f32
    %167 = vector.broadcast %cst_46 : f32 to vector<2x32xf32>
    %168 = arith.addf %167, %166 : vector<2x32xf32>
    %169 = arith.divf %167, %168 : vector<2x32xf32>
    %170 = vector.extract_strided_slice %152 {offsets = [0, 64], sizes = [2, 32], strides = [1, 1]} : vector<2x128xf32> to vector<2x32xf32>
    %171 = vector.extract_strided_slice %153 {offsets = [0, 64], sizes = [2, 32], strides = [1, 1]} : vector<2x128xf32> to vector<2x32xf32>
    %172 = arith.addf %171, %10 : vector<2x32xf32>
    %173 = arith.mulf %161, %172 : vector<2x32xf32>
    %174 = arith.addf %170, %173 : vector<2x32xf32>
    %175 = math.tanh %174 : vector<2x32xf32>
    %176 = arith.subf %150, %175 : vector<2x32xf32>
    %177 = arith.mulf %169, %176 : vector<2x32xf32>
    %178 = arith.addf %175, %177 : vector<2x32xf32>
    %c10_47 = arith.constant 10 : index
    %c0_48 = arith.constant 0 : index
    %179 = vector.load %arg13[%c10_47, %c0_48] : memref<16x32xf32, #tpu.memory_space<vmem>>, vector<2x32xf32>
    tpu.vector_store %arg13[%c10_47, %c0_48], %178 {strides = array<i32>} : memref<16x32xf32, #tpu.memory_space<vmem>>, vector<2x32xf32>,
    %c12 = arith.constant 12 : index
    %c0_49 = arith.constant 0 : index
    %180 = vector.load %arg14[%c12, %c0_49] : memref<16x128xf32, #tpu.memory_space<vmem>>, vector<2x128xf32>
    %cst_50 = arith.constant dense<0.000000e+00> : vector<2x128xf32>
    %181 = tpu.matmul %178, %7, %cst_50 {dimension_numbers = #tpu.dot_dimension_numbers<[1], [0], [0], [1], [0, 0, 1, 1], [], []>} : vector<2x32xf32>, vector<32x128xf32>, vector<2x128xf32> -> vector<2x128xf32>
    %182 = vector.extract_strided_slice %180 {offsets = [0, 0], sizes = [2, 32], strides = [1, 1]} : vector<2x128xf32> to vector<2x32xf32>
    %183 = vector.extract_strided_slice %181 {offsets = [0, 0], sizes = [2, 32], strides = [1, 1]} : vector<2x128xf32> to vector<2x32xf32>
    %184 = arith.addf %182, %183 : vector<2x32xf32>
    %185 = arith.negf %184 : vector<2x32xf32>
    %186 = math.exp %185 : vector<2x32xf32>
    %cst_51 = arith.constant 1.000000e+00 : f32
    %187 = vector.broadcast %cst_51 : f32 to vector<2x32xf32>
    %188 = arith.addf %187, %186 : vector<2x32xf32>
    %189 = arith.divf %187, %188 : vector<2x32xf32>
    %190 = vector.extract_strided_slice %180 {offsets = [0, 32], sizes = [2, 32], strides = [1, 1]} : vector<2x128xf32> to vector<2x32xf32>
    %191 = vector.extract_strided_slice %181 {offsets = [0, 32], sizes = [2, 32], strides = [1, 1]} : vector<2x128xf32> to vector<2x32xf32>
    %192 = arith.addf %190, %191 : vector<2x32xf32>
    %193 = arith.negf %192 : vector<2x32xf32>
    %194 = math.exp %193 : vector<2x32xf32>
    %cst_52 = arith.constant 1.000000e+00 : f32
    %195 = vector.broadcast %cst_52 : f32 to vector<2x32xf32>
    %196 = arith.addf %195, %194 : vector<2x32xf32>
    %197 = arith.divf %195, %196 : vector<2x32xf32>
    %198 = vector.extract_strided_slice %180 {offsets = [0, 64], sizes = [2, 32], strides = [1, 1]} : vector<2x128xf32> to vector<2x32xf32>
    %199 = vector.extract_strided_slice %181 {offsets = [0, 64], sizes = [2, 32], strides = [1, 1]} : vector<2x128xf32> to vector<2x32xf32>
    %200 = arith.addf %199, %10 : vector<2x32xf32>
    %201 = arith.mulf %189, %200 : vector<2x32xf32>
    %202 = arith.addf %198, %201 : vector<2x32xf32>
    %203 = math.tanh %202 : vector<2x32xf32>
    %204 = arith.subf %178, %203 : vector<2x32xf32>
    %205 = arith.mulf %197, %204 : vector<2x32xf32>
    %206 = arith.addf %203, %205 : vector<2x32xf32>
    %c12_53 = arith.constant 12 : index
    %c0_54 = arith.constant 0 : index
    %207 = vector.load %arg13[%c12_53, %c0_54] : memref<16x32xf32, #tpu.memory_space<vmem>>, vector<2x32xf32>
    tpu.vector_store %arg13[%c12_53, %c0_54], %206 {strides = array<i32>} : memref<16x32xf32, #tpu.memory_space<vmem>>, vector<2x32xf32>,
    %c14 = arith.constant 14 : index
    %c0_55 = arith.constant 0 : index
    %208 = vector.load %arg14[%c14, %c0_55] : memref<16x128xf32, #tpu.memory_space<vmem>>, vector<2x128xf32>
    %cst_56 = arith.constant dense<0.000000e+00> : vector<2x128xf32>
    %209 = tpu.matmul %206, %7, %cst_56 {dimension_numbers = #tpu.dot_dimension_numbers<[1], [0], [0], [1], [0, 0, 1, 1], [], []>} : vector<2x32xf32>, vector<32x128xf32>, vector<2x128xf32> -> vector<2x128xf32>
    %210 = vector.extract_strided_slice %208 {offsets = [0, 0], sizes = [2, 32], strides = [1, 1]} : vector<2x128xf32> to vector<2x32xf32>
    %211 = vector.extract_strided_slice %209 {offsets = [0, 0], sizes = [2, 32], strides = [1, 1]} : vector<2x128xf32> to vector<2x32xf32>
    %212 = arith.addf %210, %211 : vector<2x32xf32>
    %213 = arith.negf %212 : vector<2x32xf32>
    %214 = math.exp %213 : vector<2x32xf32>
    %cst_57 = arith.constant 1.000000e+00 : f32
    %215 = vector.broadcast %cst_57 : f32 to vector<2x32xf32>
    %216 = arith.addf %215, %214 : vector<2x32xf32>
    %217 = arith.divf %215, %216 : vector<2x32xf32>
    %218 = vector.extract_strided_slice %208 {offsets = [0, 32], sizes = [2, 32], strides = [1, 1]} : vector<2x128xf32> to vector<2x32xf32>
    %219 = vector.extract_strided_slice %209 {offsets = [0, 32], sizes = [2, 32], strides = [1, 1]} : vector<2x128xf32> to vector<2x32xf32>
    %220 = arith.addf %218, %219 : vector<2x32xf32>
    %221 = arith.negf %220 : vector<2x32xf32>
    %222 = math.exp %221 : vector<2x32xf32>
    %cst_58 = arith.constant 1.000000e+00 : f32
    %223 = vector.broadcast %cst_58 : f32 to vector<2x32xf32>
    %224 = arith.addf %223, %222 : vector<2x32xf32>
    %225 = arith.divf %223, %224 : vector<2x32xf32>
    %226 = vector.extract_strided_slice %208 {offsets = [0, 64], sizes = [2, 32], strides = [1, 1]} : vector<2x128xf32> to vector<2x32xf32>
    %227 = vector.extract_strided_slice %209 {offsets = [0, 64], sizes = [2, 32], strides = [1, 1]} : vector<2x128xf32> to vector<2x32xf32>
    %228 = arith.addf %227, %10 : vector<2x32xf32>
    %229 = arith.mulf %217, %228 : vector<2x32xf32>
    %230 = arith.addf %226, %229 : vector<2x32xf32>
    %231 = math.tanh %230 : vector<2x32xf32>
    %232 = arith.subf %206, %231 : vector<2x32xf32>
    %233 = arith.mulf %225, %232 : vector<2x32xf32>
    %234 = arith.addf %231, %233 : vector<2x32xf32>
    %c14_59 = arith.constant 14 : index
    %c0_60 = arith.constant 0 : index
    %235 = vector.load %arg13[%c14_59, %c0_60] : memref<16x32xf32, #tpu.memory_space<vmem>>, vector<2x32xf32>
    tpu.vector_store %arg13[%c14_59, %c0_60], %234 {strides = array<i32>} : memref<16x32xf32, #tpu.memory_space<vmem>>, vector<2x32xf32>,
    %c0_61 = arith.constant 0 : index
    %c0_62 = arith.constant 0 : index
    %236 = vector.load %arg13[%c0_61, %c0_62] : memref<16x32xf32, #tpu.memory_space<vmem>>, vector<16x32xf32>
    %c0_63 = arith.constant 0 : index
    %c0_64 = arith.constant 0 : index
    %237 = vector.load %arg6[%c0_63, %c0_64] : memref<32x128xf32, #tpu.memory_space<vmem>>, vector<32x128xf32>
    %cst_65 = arith.constant dense<0.000000e+00> : vector<16x128xf32>
    %238 = tpu.matmul %236, %237, %cst_65 {dimension_numbers = #tpu.dot_dimension_numbers<[1], [0], [0], [1], [0, 0, 1, 1], [], []>} : vector<16x32xf32>, vector<32x128xf32>, vector<16x128xf32> -> vector<16x128xf32>
    %c0_66 = arith.constant 0 : index
    %c0_67 = arith.constant 0 : index
    %239 = vector.load %arg8[%c0_66, %c0_67] : memref<1x128xf32, #tpu.memory_space<vmem>>, vector<1x128xf32>
    %240 = vector.broadcast %239 : vector<1x128xf32> to vector<16x128xf32>
    %241 = arith.addf %238, %240 : vector<16x128xf32>
    %c0_68 = arith.constant 0 : index
    %c0_69 = arith.constant 0 : index
    %242 = vector.load %arg14[%c0_68, %c0_69] : memref<16x128xf32, #tpu.memory_space<vmem>>, vector<16x128xf32>
    tpu.vector_store %arg14[%c0_68, %c0_69], %241 {strides = array<i32>} : memref<16x128xf32, #tpu.memory_space<vmem>>, vector<16x128xf32>,
    %c0_70 = arith.constant 0 : index
    %c0_71 = arith.constant 0 : index
    %243 = vector.load %arg7[%c0_70, %c0_71] : memref<32x128xf32, #tpu.memory_space<vmem>>, vector<32x128xf32>
    %c0_72 = arith.constant 0 : index
    %c0_73 = arith.constant 0 : index
    %244 = vector.load %arg9[%c0_72, %c0_73] : memref<1x32xf32, #tpu.memory_space<vmem>>, vector<1x32xf32>
    %245 = vector.shape_cast %244 : vector<1x32xf32> to vector<1x32xf32>
    %246 = vector.broadcast %245 : vector<1x32xf32> to vector<2x32xf32>
    %cst_74 = arith.constant 0.000000e+00 : f32
    %247 = vector.broadcast %cst_74 : f32 to vector<2x32xf32>
    %c0_75 = arith.constant 0 : index
    %c0_76 = arith.constant 0 : index
    %248 = vector.load %arg14[%c0_75, %c0_76] : memref<16x128xf32, #tpu.memory_space<vmem>>, vector<2x128xf32>
    %cst_77 = arith.constant dense<0.000000e+00> : vector<2x128xf32>
    %249 = tpu.matmul %247, %243, %cst_77 {dimension_numbers = #tpu.dot_dimension_numbers<[1], [0], [0], [1], [0, 0, 1, 1], [], []>} : vector<2x32xf32>, vector<32x128xf32>, vector<2x128xf32> -> vector<2x128xf32>
    %250 = vector.extract_strided_slice %248 {offsets = [0, 0], sizes = [2, 32], strides = [1, 1]} : vector<2x128xf32> to vector<2x32xf32>
    %251 = vector.extract_strided_slice %249 {offsets = [0, 0], sizes = [2, 32], strides = [1, 1]} : vector<2x128xf32> to vector<2x32xf32>
    %252 = arith.addf %250, %251 : vector<2x32xf32>
    %253 = arith.negf %252 : vector<2x32xf32>
    %254 = math.exp %253 : vector<2x32xf32>
    %cst_78 = arith.constant 1.000000e+00 : f32
    %255 = vector.broadcast %cst_78 : f32 to vector<2x32xf32>
    %256 = arith.addf %255, %254 : vector<2x32xf32>
    %257 = arith.divf %255, %256 : vector<2x32xf32>
    %258 = vector.extract_strided_slice %248 {offsets = [0, 32], sizes = [2, 32], strides = [1, 1]} : vector<2x128xf32> to vector<2x32xf32>
    %259 = vector.extract_strided_slice %249 {offsets = [0, 32], sizes = [2, 32], strides = [1, 1]} : vector<2x128xf32> to vector<2x32xf32>
    %260 = arith.addf %258, %259 : vector<2x32xf32>
    %261 = arith.negf %260 : vector<2x32xf32>
    %262 = math.exp %261 : vector<2x32xf32>
    %cst_79 = arith.constant 1.000000e+00 : f32
    %263 = vector.broadcast %cst_79 : f32 to vector<2x32xf32>
    %264 = arith.addf %263, %262 : vector<2x32xf32>
    %265 = arith.divf %263, %264 : vector<2x32xf32>
    %266 = vector.extract_strided_slice %248 {offsets = [0, 64], sizes = [2, 32], strides = [1, 1]} : vector<2x128xf32> to vector<2x32xf32>
    %267 = vector.extract_strided_slice %249 {offsets = [0, 64], sizes = [2, 32], strides = [1, 1]} : vector<2x128xf32> to vector<2x32xf32>
    %268 = arith.addf %267, %246 : vector<2x32xf32>
    %269 = arith.mulf %257, %268 : vector<2x32xf32>
    %270 = arith.addf %266, %269 : vector<2x32xf32>
    %271 = math.tanh %270 : vector<2x32xf32>
    %272 = arith.subf %247, %271 : vector<2x32xf32>
    %273 = arith.mulf %265, %272 : vector<2x32xf32>
    %274 = arith.addf %271, %273 : vector<2x32xf32>
    %c0_80 = arith.constant 0 : index
    %c0_81 = arith.constant 0 : index
    %275 = vector.load %arg13[%c0_80, %c0_81] : memref<16x32xf32, #tpu.memory_space<vmem>>, vector<2x32xf32>
    tpu.vector_store %arg13[%c0_80, %c0_81], %274 {strides = array<i32>} : memref<16x32xf32, #tpu.memory_space<vmem>>, vector<2x32xf32>,
    %c2_82 = arith.constant 2 : index
    %c0_83 = arith.constant 0 : index
    %276 = vector.load %arg14[%c2_82, %c0_83] : memref<16x128xf32, #tpu.memory_space<vmem>>, vector<2x128xf32>
    %cst_84 = arith.constant dense<0.000000e+00> : vector<2x128xf32>
    %277 = tpu.matmul %274, %243, %cst_84 {dimension_numbers = #tpu.dot_dimension_numbers<[1], [0], [0], [1], [0, 0, 1, 1], [], []>} : vector<2x32xf32>, vector<32x128xf32>, vector<2x128xf32> -> vector<2x128xf32>
    %278 = vector.extract_strided_slice %276 {offsets = [0, 0], sizes = [2, 32], strides = [1, 1]} : vector<2x128xf32> to vector<2x32xf32>
    %279 = vector.extract_strided_slice %277 {offsets = [0, 0], sizes = [2, 32], strides = [1, 1]} : vector<2x128xf32> to vector<2x32xf32>
    %280 = arith.addf %278, %279 : vector<2x32xf32>
    %281 = arith.negf %280 : vector<2x32xf32>
    %282 = math.exp %281 : vector<2x32xf32>
    %cst_85 = arith.constant 1.000000e+00 : f32
    %283 = vector.broadcast %cst_85 : f32 to vector<2x32xf32>
    %284 = arith.addf %283, %282 : vector<2x32xf32>
    %285 = arith.divf %283, %284 : vector<2x32xf32>
    %286 = vector.extract_strided_slice %276 {offsets = [0, 32], sizes = [2, 32], strides = [1, 1]} : vector<2x128xf32> to vector<2x32xf32>
    %287 = vector.extract_strided_slice %277 {offsets = [0, 32], sizes = [2, 32], strides = [1, 1]} : vector<2x128xf32> to vector<2x32xf32>
    %288 = arith.addf %286, %287 : vector<2x32xf32>
    %289 = arith.negf %288 : vector<2x32xf32>
    %290 = math.exp %289 : vector<2x32xf32>
    %cst_86 = arith.constant 1.000000e+00 : f32
    %291 = vector.broadcast %cst_86 : f32 to vector<2x32xf32>
    %292 = arith.addf %291, %290 : vector<2x32xf32>
    %293 = arith.divf %291, %292 : vector<2x32xf32>
    %294 = vector.extract_strided_slice %276 {offsets = [0, 64], sizes = [2, 32], strides = [1, 1]} : vector<2x128xf32> to vector<2x32xf32>
    %295 = vector.extract_strided_slice %277 {offsets = [0, 64], sizes = [2, 32], strides = [1, 1]} : vector<2x128xf32> to vector<2x32xf32>
    %296 = arith.addf %295, %246 : vector<2x32xf32>
    %297 = arith.mulf %285, %296 : vector<2x32xf32>
    %298 = arith.addf %294, %297 : vector<2x32xf32>
    %299 = math.tanh %298 : vector<2x32xf32>
    %300 = arith.subf %274, %299 : vector<2x32xf32>
    %301 = arith.mulf %293, %300 : vector<2x32xf32>
    %302 = arith.addf %299, %301 : vector<2x32xf32>
    %c2_87 = arith.constant 2 : index
    %c0_88 = arith.constant 0 : index
    %303 = vector.load %arg13[%c2_87, %c0_88] : memref<16x32xf32, #tpu.memory_space<vmem>>, vector<2x32xf32>
    tpu.vector_store %arg13[%c2_87, %c0_88], %302 {strides = array<i32>} : memref<16x32xf32, #tpu.memory_space<vmem>>, vector<2x32xf32>,
    %c4_89 = arith.constant 4 : index
    %c0_90 = arith.constant 0 : index
    %304 = vector.load %arg14[%c4_89, %c0_90] : memref<16x128xf32, #tpu.memory_space<vmem>>, vector<2x128xf32>
    %cst_91 = arith.constant dense<0.000000e+00> : vector<2x128xf32>
    %305 = tpu.matmul %302, %243, %cst_91 {dimension_numbers = #tpu.dot_dimension_numbers<[1], [0], [0], [1], [0, 0, 1, 1], [], []>} : vector<2x32xf32>, vector<32x128xf32>, vector<2x128xf32> -> vector<2x128xf32>
    %306 = vector.extract_strided_slice %304 {offsets = [0, 0], sizes = [2, 32], strides = [1, 1]} : vector<2x128xf32> to vector<2x32xf32>
    %307 = vector.extract_strided_slice %305 {offsets = [0, 0], sizes = [2, 32], strides = [1, 1]} : vector<2x128xf32> to vector<2x32xf32>
    %308 = arith.addf %306, %307 : vector<2x32xf32>
    %309 = arith.negf %308 : vector<2x32xf32>
    %310 = math.exp %309 : vector<2x32xf32>
    %cst_92 = arith.constant 1.000000e+00 : f32
    %311 = vector.broadcast %cst_92 : f32 to vector<2x32xf32>
    %312 = arith.addf %311, %310 : vector<2x32xf32>
    %313 = arith.divf %311, %312 : vector<2x32xf32>
    %314 = vector.extract_strided_slice %304 {offsets = [0, 32], sizes = [2, 32], strides = [1, 1]} : vector<2x128xf32> to vector<2x32xf32>
    %315 = vector.extract_strided_slice %305 {offsets = [0, 32], sizes = [2, 32], strides = [1, 1]} : vector<2x128xf32> to vector<2x32xf32>
    %316 = arith.addf %314, %315 : vector<2x32xf32>
    %317 = arith.negf %316 : vector<2x32xf32>
    %318 = math.exp %317 : vector<2x32xf32>
    %cst_93 = arith.constant 1.000000e+00 : f32
    %319 = vector.broadcast %cst_93 : f32 to vector<2x32xf32>
    %320 = arith.addf %319, %318 : vector<2x32xf32>
    %321 = arith.divf %319, %320 : vector<2x32xf32>
    %322 = vector.extract_strided_slice %304 {offsets = [0, 64], sizes = [2, 32], strides = [1, 1]} : vector<2x128xf32> to vector<2x32xf32>
    %323 = vector.extract_strided_slice %305 {offsets = [0, 64], sizes = [2, 32], strides = [1, 1]} : vector<2x128xf32> to vector<2x32xf32>
    %324 = arith.addf %323, %246 : vector<2x32xf32>
    %325 = arith.mulf %313, %324 : vector<2x32xf32>
    %326 = arith.addf %322, %325 : vector<2x32xf32>
    %327 = math.tanh %326 : vector<2x32xf32>
    %328 = arith.subf %302, %327 : vector<2x32xf32>
    %329 = arith.mulf %321, %328 : vector<2x32xf32>
    %330 = arith.addf %327, %329 : vector<2x32xf32>
    %c4_94 = arith.constant 4 : index
    %c0_95 = arith.constant 0 : index
    %331 = vector.load %arg13[%c4_94, %c0_95] : memref<16x32xf32, #tpu.memory_space<vmem>>, vector<2x32xf32>
    tpu.vector_store %arg13[%c4_94, %c0_95], %330 {strides = array<i32>} : memref<16x32xf32, #tpu.memory_space<vmem>>, vector<2x32xf32>,
    %c6_96 = arith.constant 6 : index
    %c0_97 = arith.constant 0 : index
    %332 = vector.load %arg14[%c6_96, %c0_97] : memref<16x128xf32, #tpu.memory_space<vmem>>, vector<2x128xf32>
    %cst_98 = arith.constant dense<0.000000e+00> : vector<2x128xf32>
    %333 = tpu.matmul %330, %243, %cst_98 {dimension_numbers = #tpu.dot_dimension_numbers<[1], [0], [0], [1], [0, 0, 1, 1], [], []>} : vector<2x32xf32>, vector<32x128xf32>, vector<2x128xf32> -> vector<2x128xf32>
    %334 = vector.extract_strided_slice %332 {offsets = [0, 0], sizes = [2, 32], strides = [1, 1]} : vector<2x128xf32> to vector<2x32xf32>
    %335 = vector.extract_strided_slice %333 {offsets = [0, 0], sizes = [2, 32], strides = [1, 1]} : vector<2x128xf32> to vector<2x32xf32>
    %336 = arith.addf %334, %335 : vector<2x32xf32>
    %337 = arith.negf %336 : vector<2x32xf32>
    %338 = math.exp %337 : vector<2x32xf32>
    %cst_99 = arith.constant 1.000000e+00 : f32
    %339 = vector.broadcast %cst_99 : f32 to vector<2x32xf32>
    %340 = arith.addf %339, %338 : vector<2x32xf32>
    %341 = arith.divf %339, %340 : vector<2x32xf32>
    %342 = vector.extract_strided_slice %332 {offsets = [0, 32], sizes = [2, 32], strides = [1, 1]} : vector<2x128xf32> to vector<2x32xf32>
    %343 = vector.extract_strided_slice %333 {offsets = [0, 32], sizes = [2, 32], strides = [1, 1]} : vector<2x128xf32> to vector<2x32xf32>
    %344 = arith.addf %342, %343 : vector<2x32xf32>
    %345 = arith.negf %344 : vector<2x32xf32>
    %346 = math.exp %345 : vector<2x32xf32>
    %cst_100 = arith.constant 1.000000e+00 : f32
    %347 = vector.broadcast %cst_100 : f32 to vector<2x32xf32>
    %348 = arith.addf %347, %346 : vector<2x32xf32>
    %349 = arith.divf %347, %348 : vector<2x32xf32>
    %350 = vector.extract_strided_slice %332 {offsets = [0, 64], sizes = [2, 32], strides = [1, 1]} : vector<2x128xf32> to vector<2x32xf32>
    %351 = vector.extract_strided_slice %333 {offsets = [0, 64], sizes = [2, 32], strides = [1, 1]} : vector<2x128xf32> to vector<2x32xf32>
    %352 = arith.addf %351, %246 : vector<2x32xf32>
    %353 = arith.mulf %341, %352 : vector<2x32xf32>
    %354 = arith.addf %350, %353 : vector<2x32xf32>
    %355 = math.tanh %354 : vector<2x32xf32>
    %356 = arith.subf %330, %355 : vector<2x32xf32>
    %357 = arith.mulf %349, %356 : vector<2x32xf32>
    %358 = arith.addf %355, %357 : vector<2x32xf32>
    %c6_101 = arith.constant 6 : index
    %c0_102 = arith.constant 0 : index
    %359 = vector.load %arg13[%c6_101, %c0_102] : memref<16x32xf32, #tpu.memory_space<vmem>>, vector<2x32xf32>
    tpu.vector_store %arg13[%c6_101, %c0_102], %358 {strides = array<i32>} : memref<16x32xf32, #tpu.memory_space<vmem>>, vector<2x32xf32>,
    %c8_103 = arith.constant 8 : index
    %c0_104 = arith.constant 0 : index
    %360 = vector.load %arg14[%c8_103, %c0_104] : memref<16x128xf32, #tpu.memory_space<vmem>>, vector<2x128xf32>
    %cst_105 = arith.constant dense<0.000000e+00> : vector<2x128xf32>
    %361 = tpu.matmul %358, %243, %cst_105 {dimension_numbers = #tpu.dot_dimension_numbers<[1], [0], [0], [1], [0, 0, 1, 1], [], []>} : vector<2x32xf32>, vector<32x128xf32>, vector<2x128xf32> -> vector<2x128xf32>
    %362 = vector.extract_strided_slice %360 {offsets = [0, 0], sizes = [2, 32], strides = [1, 1]} : vector<2x128xf32> to vector<2x32xf32>
    %363 = vector.extract_strided_slice %361 {offsets = [0, 0], sizes = [2, 32], strides = [1, 1]} : vector<2x128xf32> to vector<2x32xf32>
    %364 = arith.addf %362, %363 : vector<2x32xf32>
    %365 = arith.negf %364 : vector<2x32xf32>
    %366 = math.exp %365 : vector<2x32xf32>
    %cst_106 = arith.constant 1.000000e+00 : f32
    %367 = vector.broadcast %cst_106 : f32 to vector<2x32xf32>
    %368 = arith.addf %367, %366 : vector<2x32xf32>
    %369 = arith.divf %367, %368 : vector<2x32xf32>
    %370 = vector.extract_strided_slice %360 {offsets = [0, 32], sizes = [2, 32], strides = [1, 1]} : vector<2x128xf32> to vector<2x32xf32>
    %371 = vector.extract_strided_slice %361 {offsets = [0, 32], sizes = [2, 32], strides = [1, 1]} : vector<2x128xf32> to vector<2x32xf32>
    %372 = arith.addf %370, %371 : vector<2x32xf32>
    %373 = arith.negf %372 : vector<2x32xf32>
    %374 = math.exp %373 : vector<2x32xf32>
    %cst_107 = arith.constant 1.000000e+00 : f32
    %375 = vector.broadcast %cst_107 : f32 to vector<2x32xf32>
    %376 = arith.addf %375, %374 : vector<2x32xf32>
    %377 = arith.divf %375, %376 : vector<2x32xf32>
    %378 = vector.extract_strided_slice %360 {offsets = [0, 64], sizes = [2, 32], strides = [1, 1]} : vector<2x128xf32> to vector<2x32xf32>
    %379 = vector.extract_strided_slice %361 {offsets = [0, 64], sizes = [2, 32], strides = [1, 1]} : vector<2x128xf32> to vector<2x32xf32>
    %380 = arith.addf %379, %246 : vector<2x32xf32>
    %381 = arith.mulf %369, %380 : vector<2x32xf32>
    %382 = arith.addf %378, %381 : vector<2x32xf32>
    %383 = math.tanh %382 : vector<2x32xf32>
    %384 = arith.subf %358, %383 : vector<2x32xf32>
    %385 = arith.mulf %377, %384 : vector<2x32xf32>
    %386 = arith.addf %383, %385 : vector<2x32xf32>
    %c8_108 = arith.constant 8 : index
    %c0_109 = arith.constant 0 : index
    %387 = vector.load %arg13[%c8_108, %c0_109] : memref<16x32xf32, #tpu.memory_space<vmem>>, vector<2x32xf32>
    tpu.vector_store %arg13[%c8_108, %c0_109], %386 {strides = array<i32>} : memref<16x32xf32, #tpu.memory_space<vmem>>, vector<2x32xf32>,
    %c10_110 = arith.constant 10 : index
    %c0_111 = arith.constant 0 : index
    %388 = vector.load %arg14[%c10_110, %c0_111] : memref<16x128xf32, #tpu.memory_space<vmem>>, vector<2x128xf32>
    %cst_112 = arith.constant dense<0.000000e+00> : vector<2x128xf32>
    %389 = tpu.matmul %386, %243, %cst_112 {dimension_numbers = #tpu.dot_dimension_numbers<[1], [0], [0], [1], [0, 0, 1, 1], [], []>} : vector<2x32xf32>, vector<32x128xf32>, vector<2x128xf32> -> vector<2x128xf32>
    %390 = vector.extract_strided_slice %388 {offsets = [0, 0], sizes = [2, 32], strides = [1, 1]} : vector<2x128xf32> to vector<2x32xf32>
    %391 = vector.extract_strided_slice %389 {offsets = [0, 0], sizes = [2, 32], strides = [1, 1]} : vector<2x128xf32> to vector<2x32xf32>
    %392 = arith.addf %390, %391 : vector<2x32xf32>
    %393 = arith.negf %392 : vector<2x32xf32>
    %394 = math.exp %393 : vector<2x32xf32>
    %cst_113 = arith.constant 1.000000e+00 : f32
    %395 = vector.broadcast %cst_113 : f32 to vector<2x32xf32>
    %396 = arith.addf %395, %394 : vector<2x32xf32>
    %397 = arith.divf %395, %396 : vector<2x32xf32>
    %398 = vector.extract_strided_slice %388 {offsets = [0, 32], sizes = [2, 32], strides = [1, 1]} : vector<2x128xf32> to vector<2x32xf32>
    %399 = vector.extract_strided_slice %389 {offsets = [0, 32], sizes = [2, 32], strides = [1, 1]} : vector<2x128xf32> to vector<2x32xf32>
    %400 = arith.addf %398, %399 : vector<2x32xf32>
    %401 = arith.negf %400 : vector<2x32xf32>
    %402 = math.exp %401 : vector<2x32xf32>
    %cst_114 = arith.constant 1.000000e+00 : f32
    %403 = vector.broadcast %cst_114 : f32 to vector<2x32xf32>
    %404 = arith.addf %403, %402 : vector<2x32xf32>
    %405 = arith.divf %403, %404 : vector<2x32xf32>
    %406 = vector.extract_strided_slice %388 {offsets = [0, 64], sizes = [2, 32], strides = [1, 1]} : vector<2x128xf32> to vector<2x32xf32>
    %407 = vector.extract_strided_slice %389 {offsets = [0, 64], sizes = [2, 32], strides = [1, 1]} : vector<2x128xf32> to vector<2x32xf32>
    %408 = arith.addf %407, %246 : vector<2x32xf32>
    %409 = arith.mulf %397, %408 : vector<2x32xf32>
    %410 = arith.addf %406, %409 : vector<2x32xf32>
    %411 = math.tanh %410 : vector<2x32xf32>
    %412 = arith.subf %386, %411 : vector<2x32xf32>
    %413 = arith.mulf %405, %412 : vector<2x32xf32>
    %414 = arith.addf %411, %413 : vector<2x32xf32>
    %c10_115 = arith.constant 10 : index
    %c0_116 = arith.constant 0 : index
    %415 = vector.load %arg13[%c10_115, %c0_116] : memref<16x32xf32, #tpu.memory_space<vmem>>, vector<2x32xf32>
    tpu.vector_store %arg13[%c10_115, %c0_116], %414 {strides = array<i32>} : memref<16x32xf32, #tpu.memory_space<vmem>>, vector<2x32xf32>,
    %c12_117 = arith.constant 12 : index
    %c0_118 = arith.constant 0 : index
    %416 = vector.load %arg14[%c12_117, %c0_118] : memref<16x128xf32, #tpu.memory_space<vmem>>, vector<2x128xf32>
    %cst_119 = arith.constant dense<0.000000e+00> : vector<2x128xf32>
    %417 = tpu.matmul %414, %243, %cst_119 {dimension_numbers = #tpu.dot_dimension_numbers<[1], [0], [0], [1], [0, 0, 1, 1], [], []>} : vector<2x32xf32>, vector<32x128xf32>, vector<2x128xf32> -> vector<2x128xf32>
    %418 = vector.extract_strided_slice %416 {offsets = [0, 0], sizes = [2, 32], strides = [1, 1]} : vector<2x128xf32> to vector<2x32xf32>
    %419 = vector.extract_strided_slice %417 {offsets = [0, 0], sizes = [2, 32], strides = [1, 1]} : vector<2x128xf32> to vector<2x32xf32>
    %420 = arith.addf %418, %419 : vector<2x32xf32>
    %421 = arith.negf %420 : vector<2x32xf32>
    %422 = math.exp %421 : vector<2x32xf32>
    %cst_120 = arith.constant 1.000000e+00 : f32
    %423 = vector.broadcast %cst_120 : f32 to vector<2x32xf32>
    %424 = arith.addf %423, %422 : vector<2x32xf32>
    %425 = arith.divf %423, %424 : vector<2x32xf32>
    %426 = vector.extract_strided_slice %416 {offsets = [0, 32], sizes = [2, 32], strides = [1, 1]} : vector<2x128xf32> to vector<2x32xf32>
    %427 = vector.extract_strided_slice %417 {offsets = [0, 32], sizes = [2, 32], strides = [1, 1]} : vector<2x128xf32> to vector<2x32xf32>
    %428 = arith.addf %426, %427 : vector<2x32xf32>
    %429 = arith.negf %428 : vector<2x32xf32>
    %430 = math.exp %429 : vector<2x32xf32>
    %cst_121 = arith.constant 1.000000e+00 : f32
    %431 = vector.broadcast %cst_121 : f32 to vector<2x32xf32>
    %432 = arith.addf %431, %430 : vector<2x32xf32>
    %433 = arith.divf %431, %432 : vector<2x32xf32>
    %434 = vector.extract_strided_slice %416 {offsets = [0, 64], sizes = [2, 32], strides = [1, 1]} : vector<2x128xf32> to vector<2x32xf32>
    %435 = vector.extract_strided_slice %417 {offsets = [0, 64], sizes = [2, 32], strides = [1, 1]} : vector<2x128xf32> to vector<2x32xf32>
    %436 = arith.addf %435, %246 : vector<2x32xf32>
    %437 = arith.mulf %425, %436 : vector<2x32xf32>
    %438 = arith.addf %434, %437 : vector<2x32xf32>
    %439 = math.tanh %438 : vector<2x32xf32>
    %440 = arith.subf %414, %439 : vector<2x32xf32>
    %441 = arith.mulf %433, %440 : vector<2x32xf32>
    %442 = arith.addf %439, %441 : vector<2x32xf32>
    %c12_122 = arith.constant 12 : index
    %c0_123 = arith.constant 0 : index
    %443 = vector.load %arg13[%c12_122, %c0_123] : memref<16x32xf32, #tpu.memory_space<vmem>>, vector<2x32xf32>
    tpu.vector_store %arg13[%c12_122, %c0_123], %442 {strides = array<i32>} : memref<16x32xf32, #tpu.memory_space<vmem>>, vector<2x32xf32>,
    %c14_124 = arith.constant 14 : index
    %c0_125 = arith.constant 0 : index
    %444 = vector.load %arg14[%c14_124, %c0_125] : memref<16x128xf32, #tpu.memory_space<vmem>>, vector<2x128xf32>
    %cst_126 = arith.constant dense<0.000000e+00> : vector<2x128xf32>
    %445 = tpu.matmul %442, %243, %cst_126 {dimension_numbers = #tpu.dot_dimension_numbers<[1], [0], [0], [1], [0, 0, 1, 1], [], []>} : vector<2x32xf32>, vector<32x128xf32>, vector<2x128xf32> -> vector<2x128xf32>
    %446 = vector.extract_strided_slice %444 {offsets = [0, 0], sizes = [2, 32], strides = [1, 1]} : vector<2x128xf32> to vector<2x32xf32>
    %447 = vector.extract_strided_slice %445 {offsets = [0, 0], sizes = [2, 32], strides = [1, 1]} : vector<2x128xf32> to vector<2x32xf32>
    %448 = arith.addf %446, %447 : vector<2x32xf32>
    %449 = arith.negf %448 : vector<2x32xf32>
    %450 = math.exp %449 : vector<2x32xf32>
    %cst_127 = arith.constant 1.000000e+00 : f32
    %451 = vector.broadcast %cst_127 : f32 to vector<2x32xf32>
    %452 = arith.addf %451, %450 : vector<2x32xf32>
    %453 = arith.divf %451, %452 : vector<2x32xf32>
    %454 = vector.extract_strided_slice %444 {offsets = [0, 32], sizes = [2, 32], strides = [1, 1]} : vector<2x128xf32> to vector<2x32xf32>
    %455 = vector.extract_strided_slice %445 {offsets = [0, 32], sizes = [2, 32], strides = [1, 1]} : vector<2x128xf32> to vector<2x32xf32>
    %456 = arith.addf %454, %455 : vector<2x32xf32>
    %457 = arith.negf %456 : vector<2x32xf32>
    %458 = math.exp %457 : vector<2x32xf32>
    %cst_128 = arith.constant 1.000000e+00 : f32
    %459 = vector.broadcast %cst_128 : f32 to vector<2x32xf32>
    %460 = arith.addf %459, %458 : vector<2x32xf32>
    %461 = arith.divf %459, %460 : vector<2x32xf32>
    %462 = vector.extract_strided_slice %444 {offsets = [0, 64], sizes = [2, 32], strides = [1, 1]} : vector<2x128xf32> to vector<2x32xf32>
    %463 = vector.extract_strided_slice %445 {offsets = [0, 64], sizes = [2, 32], strides = [1, 1]} : vector<2x128xf32> to vector<2x32xf32>
    %464 = arith.addf %463, %246 : vector<2x32xf32>
    %465 = arith.mulf %453, %464 : vector<2x32xf32>
    %466 = arith.addf %462, %465 : vector<2x32xf32>
    %467 = math.tanh %466 : vector<2x32xf32>
    %468 = arith.subf %442, %467 : vector<2x32xf32>
    %469 = arith.mulf %461, %468 : vector<2x32xf32>
    %470 = arith.addf %467, %469 : vector<2x32xf32>
    %c14_129 = arith.constant 14 : index
    %c0_130 = arith.constant 0 : index
    %471 = vector.load %arg13[%c14_129, %c0_130] : memref<16x32xf32, #tpu.memory_space<vmem>>, vector<2x32xf32>
    tpu.vector_store %arg13[%c14_129, %c0_130], %470 {strides = array<i32>} : memref<16x32xf32, #tpu.memory_space<vmem>>, vector<2x32xf32>,
    %c0_131 = arith.constant 0 : index
    %c0_132 = arith.constant 0 : index
    %472 = vector.load %arg13[%c0_131, %c0_132] : memref<16x32xf32, #tpu.memory_space<vmem>>, vector<16x32xf32>
    %c0_133 = arith.constant 0 : index
    %c0_134 = arith.constant 0 : index
    %473 = vector.load %arg10[%c0_133, %c0_134] : memref<32x128xf32, #tpu.memory_space<vmem>>, vector<32x128xf32>
    %cst_135 = arith.constant dense<0.000000e+00> : vector<16x128xf32>
    %474 = tpu.matmul %472, %473, %cst_135 {dimension_numbers = #tpu.dot_dimension_numbers<[1], [0], [0], [1], [0, 0, 1, 1], [], []>} : vector<16x32xf32>, vector<32x128xf32>, vector<16x128xf32> -> vector<16x128xf32>
    %c0_136 = arith.constant 0 : index
    %c0_137 = arith.constant 0 : index
    %475 = vector.load %arg11[%c0_136, %c0_137] : memref<1x128xf32, #tpu.memory_space<vmem>>, vector<1x128xf32>
    %476 = vector.broadcast %475 : vector<1x128xf32> to vector<16x128xf32>
    %477 = arith.addf %474, %476 : vector<16x128xf32>
    %c0_138 = arith.constant 0 : index
    %c0_139 = arith.constant 0 : index
    %478 = vector.load %arg12[%c0_138, %c0_139] : memref<16x128xf32, #tpu.memory_space<vmem>>, vector<16x128xf32>
    tpu.vector_store %arg12[%c0_138, %c0_139], %477 {strides = array<i32>} : memref<16x128xf32, #tpu.memory_space<vmem>>, vector<16x128xf32>,
    return
  }
  func.func @transform_0(%arg0: i32) -> (i32, i32) {
    %c0_i32 = arith.constant 0 : i32
    %c0_i32_0 = arith.constant 0 : i32
    %c0_i32_1 = arith.constant 0 : i32
    return %c0_i32, %c0_i32_0 : i32, i32
  }
  func.func @transform_1(%arg0: i32) -> (i32, i32) {
    %c0_i32 = arith.constant 0 : i32
    %c0_i32_0 = arith.constant 0 : i32
    %c0_i32_1 = arith.constant 0 : i32
    return %c0_i32, %c0_i32_0 : i32, i32
  }
  func.func @transform_2(%arg0: i32) -> (i32, i32) {
    %c0_i32 = arith.constant 0 : i32
    %c0_i32_0 = arith.constant 0 : i32
    %c0_i32_1 = arith.constant 0 : i32
    return %c0_i32, %c0_i32_0 : i32, i32
  }
  func.func @transform_3(%arg0: i32) -> (i32, i32) {
    %c0_i32 = arith.constant 0 : i32
    %c0_i32_0 = arith.constant 0 : i32
    %c0_i32_1 = arith.constant 0 : i32
    return %c0_i32, %c0_i32_0 : i32, i32
  }
  func.func @transform_4(%arg0: i32) -> (i32, i32) {
    %c0_i32 = arith.constant 0 : i32
    %c0_i32_0 = arith.constant 0 : i32
    %c0_i32_1 = arith.constant 0 : i32
    return %c0_i32, %c0_i32_0 : i32, i32
  }
  func.func @transform_5(%arg0: i32) -> (i32, i32) {
    %c0_i32 = arith.constant 0 : i32
    %c0_i32_0 = arith.constant 0 : i32
    %c0_i32_1 = arith.constant 0 : i32
    return %c0_i32, %c0_i32_0 : i32, i32
  }
  func.func @transform_6(%arg0: i32) -> (i32, i32) {
    %c0_i32 = arith.constant 0 : i32
    %c0_i32_0 = arith.constant 0 : i32
    %c0_i32_1 = arith.constant 0 : i32
    return %c0_i32, %c0_i32_0 : i32, i32
  }
  func.func @transform_7(%arg0: i32) -> (i32, i32) {
    %c0_i32 = arith.constant 0 : i32
    %c0_i32_0 = arith.constant 0 : i32
    %c0_i32_1 = arith.constant 0 : i32
    return %c0_i32, %c0_i32_0 : i32, i32
  }
  func.func @transform_8(%arg0: i32) -> (i32, i32) {
    %c0_i32 = arith.constant 0 : i32
    %c0_i32_0 = arith.constant 0 : i32
    %c0_i32_1 = arith.constant 0 : i32
    return %c0_i32, %c0_i32_0 : i32, i32
  }
  func.func @transform_9(%arg0: i32) -> (i32, i32) {
    %c0_i32 = arith.constant 0 : i32
    %c0_i32_0 = arith.constant 0 : i32
    %c0_i32_1 = arith.constant 0 : i32
    return %c0_i32, %c0_i32_0 : i32, i32
  }
  func.func @transform_10(%arg0: i32) -> (i32, i32) {
    %c0_i32 = arith.constant 0 : i32
    %c0_i32_0 = arith.constant 0 : i32
    %c0_i32_1 = arith.constant 0 : i32
    return %c0_i32, %c0_i32_0 : i32, i32
  }
  func.func @transform_11(%arg0: i32) -> (i32, i32) {
    %c0_i32 = arith.constant 0 : i32
    %c0_i32_0 = arith.constant 0 : i32
    %c0_i32_1 = arith.constant 0 : i32
    return %c0_i32, %c0_i32_0 : i32, i32
  }
}

</mosaic_0001>

<bundles_post_ra>
// kernel: tpu_custom_call.1
= control target key start
LH: loop header
LB: loop body
LE: loop exit
PB: predicated region body
PF: predicated region fallthrough
CT: control target
= control target key end

     0   :  { %16 = vsyncpa [#allocation5], 0  ;;  %s2096_s0 = inlined_call_operand.hbm [shape: f32[16,16], index: 0, kind: input, shape index: {}]   ;;  %s2097_s1 = inlined_call_operand.hbm [shape: f32[16,128], index: 1, kind: input, shape index: {}]   ;;  %s2098_s2 = inlined_call_operand.hbm [shape: f32[32,128], index: 2, kind: input, shape index: {}]   ;;  %s2099_s3 = inlined_call_operand.vmem [shape: f32[1,128], index: 3, kind: input, shape index: {}]   ;;  %s2100_s4 = inlined_call_operand.vmem [shape: f32[1,32], index: 4, kind: input, shape index: {}]   ;;  %s2101_s5 = inlined_call_operand.hbm [shape: f32[32,128], index: 5, kind: input, shape index: {}]   ;;  %s2102_s6 = inlined_call_operand.hbm [shape: f32[32,128], index: 6, kind: input, shape index: {}]   ;;  %s2103_s7 = inlined_call_operand.vmem [shape: f32[1,128], index: 7, kind: input, shape index: {}]   ;;  %s2104_s8 = inlined_call_operand.vmem [shape: f32[1,32], index: 8, kind: input, shape index: {}]   ;;  %s2105_s9 = inlined_call_operand.hbm [shape: f32[32,128], index: 9, kind: input, shape index: {}]   ;;  %s2106_s10 = inlined_call_operand.vmem [shape: f32[1,128], index: 10, kind: input, shape index: {}]   ;;  %s2107_s11 = inlined_call_operand.hbm [shape: f32[16,128], index: 11, kind: output, shape index: {}]  }
   0x1   :  { %17 = vsyncpa [#allocation8], 0 }
   0x2   :  { %18 = vsyncpa [#allocation11], 0 }
   0x3   :  { %19 = vsyncpa [#allocation14], 0 }
   0x4   :  { %20 = vsyncpa [#allocation6], 0  ;;  %s38_s19 = sshll.u32 %s2097_s1, 4  ;;  %s1764_s20 = smov [#allocation7]   ;;  %s39_s19 = int_to_ptr.hbm [resolvable:$true] %s38_s19 }
   0x5   :  { %s40_s21 = sshll.u32 %s1764_s20, 4  ;;  %s68_s24 = sshll.u32 %s2101_s5, 4  ;;  %s41_s21 = int_to_ptr.vmem [resolvable:$true] %s40_s21  ;;  %s69_s24 = int_to_ptr.hbm [resolvable:$true] %s68_s24 }
   0x6   :  { %s1765_s25 = smov 128   ;;  %s1766_s26 = smov 8  }
   0x7   :  { %46 = dma.hbm_to_vmem [thread:$0]  %s39_s19, 256, %s41_s21, [#allocation8], %s1765_s25, %s1765_s25, %s1766_s26  }
   0x8   :  { %s1767_s27 = smov [#allocation10]   ;;  %s25_s1 = sshll.u32 %s2096_s0, 4  ;;  %s26_s1 = int_to_ptr.hbm [resolvable:$true] %s25_s1 }
   0x9   :  { %s70_s28 = sshll.u32 %s1767_s27, 4  ;;  %s51_s13 = sshll.u32 %s2098_s2, 4  ;;  %s71_s28 = int_to_ptr.vmem [resolvable:$true] %s70_s28  ;;  %s52_s13 = int_to_ptr.hbm [resolvable:$true] %s51_s13 }
   0xa   :  { %76 = dma.hbm_to_vmem [thread:$0]  %s69_s24, 512, %s71_s28, [#allocation11], %s1765_s25, %s1765_s25, %s1766_s26  }
   0xb   :  { %s1768_s14 = smov [#allocation4]   ;;  %s1769_s16 = smov [#allocation9]  }
   0xc   :  { %s27_s15 = sshll.u32 %s1768_s14, 4  ;;  %s53_s0 = sshll.u32 %s1769_s16, 4  ;;  %s28_s15 = int_to_ptr.vmem [resolvable:$true] %s27_s15  ;;  %s54_s0 = int_to_ptr.vmem [resolvable:$true] %s53_s0 }
   0xd   :  { %33 = dma.hbm_to_vmem [thread:$0]  %s26_s1, 256, %s28_s15, [#allocation5], %s1765_s25, %s1765_s25, %s1766_s26  }
   0xe   :  { %s81_s19 = sshll.u32 %s2102_s6, 4  ;;  %s98_s21 = sshll.u32 %s2105_s9, 4  ;;  %s82_s19 = int_to_ptr.hbm [resolvable:$true] %s81_s19  ;;  %s99_s21 = int_to_ptr.hbm [resolvable:$true] %s98_s21 }
   0xf   :  { %59 = dma.hbm_to_vmem [thread:$0]  %s52_s13, 512, %s54_s0, [#allocation8], %s1765_s25, %s1765_s25, %s1766_s26  }
  0x10   :  { %s1770_s22 = smov [#allocation12]   ;;  %s1771_s24 = smov [#allocation13]  }
  0x11   :  { %s83_s23 = sshll.u32 %s1770_s22, 4  ;;  %s100_s6 = sshll.u32 %s1771_s24, 4  ;;  %s84_s23 = int_to_ptr.vmem [resolvable:$true] %s83_s23  ;;  %s101_s6 = int_to_ptr.vmem [resolvable:$true] %s100_s6 }
  0x12   :  { %89 = dma.hbm_to_vmem [thread:$0]  %s82_s19, 512, %s84_s23, [#allocation11], %s1765_s25, %s1765_s25, %s1766_s26  }
  0x13   :  { %106 = dma.hbm_to_vmem [thread:$0]  %s99_s21, 512, %s101_s6, [#allocation14], %s1765_s25, %s1765_s25, %s1766_s26  }
  0x14   :  { %1754 = dma.done.wait [#allocation5], 256  }
  0x15   :  { %1755 = vsyncadd [#allocation5], 4294967040 }
  0x16   :  { %1756 = dma.done.wait [#allocation8], 768  }
  0x17   :  { %1757 = vsyncadd [#allocation8], 4294966528 }
  0x18   :  { %1758 = dma.done.wait [#allocation11], 1024  }
  0x19   :  { %1759 = vsyncadd [#allocation11], 4294966272 }
  0x1a   :  { %1760 = dma.done.wait [#allocation14], 512  }
  0x1b   :  { %1761 = vsyncadd [#allocation14], 4294966784  ;;  %v136_v0 = vld [vmem:[#allocation7 + $0x8] sm:$0xff]  ;;  %v135_v1 = vld [vmem:[#allocation7] sm:$0xff]  ;;  %vm141_vm0 = vcmask 130048   ;;  %s1772_s28 = smov 64  }
  0x1c   :  { %162 = vmatpush.msra.mxu0 %v136_v0  ;;  %1470 = vmatpush.msra.mxu1 %v136_v0  ;;  %v133_v2 = vld [vmem:[#allocation4] sm:$0xff]  ;;  %v134_v3 = vld [vmem:[#allocation4 + $0x8] sm:$0xff]  ;;  %v176_v4 = vld [vmem:[#allocation9 + $0x18] sm:$0xff]  ;;  %v1773_v9 = vmov 0.0   ;;  %s1775_s30 = smov 32   ;;  %vm255_vm5 = vcmask 254976  }
  0x1d   :  { %272 = vmatpush.msra.mxu2 %v176_v4  ;;  %343 = vmatpush.msra.mxu3 %v176_v4  ;;  %v175_v5 = vld [vmem:[#allocation9 + $0x10] sm:$0xff]  ;;  %v1485_v6 = vld [vmem:[%s2100_s4] ss:$0 sm:$0xff]  ;;  %v174_v7 = vld [vmem:[#allocation9 + $0x8] sm:$0xff]  ;;  %vm181_vm6 = vcmask 261120   ;;  %s1418_s0 = sshll.u32 %s2107_s11, 4  ;;  %s1419_s0 = int_to_ptr.hbm [resolvable:$true] %s1418_s0 }
  0x1e   :  { %163 = vmatpush.msra.mxu0 %v135_v1  ;;  %1471 = vmatpush.msra.mxu1 %v135_v1  ;;  %v173_v8 = vld [vmem:[#allocation9] sm:$0xff] }
  0x1f   :  { %1434 = vmatmul.msk.f32.vlgmr.msra.gmra.mxu0 %vm141_vm0, %v133_v2  ;;  %1435 = vmatmul.msk.f32.vlgmr.msra.gmra.mxu1 %vm141_vm0, %v134_v3  ;;  %v1486_v10 = vld [vmem:[%s2099_s3] ss:$0 sm:$0xff]  ;;  %s1774_s3 = smov 96  }
  0x20   :  { %197 = vmatpush.msrb.mxu1 %v176_v4  ;;  %225 = vrot.lane.b32.xlu0 %v1485_v6, %s1772_s28 }
  0x21   :  { %273 = vmatpush.msra.mxu2 %v175_v5  ;;  %344 = vmatpush.msra.mxu3 %v175_v5 }
  0x22   :  { %198 = vmatpush.msrb.mxu1 %v175_v5  ;;  %627 = vmatpush.msrb.mxu0 %v176_v4 }
  0x23   :  { %274 = vmatpush.msra.mxu2 %v174_v7  ;;  %345 = vmatpush.msra.mxu3 %v174_v7 }
  0x24   :  { %199 = vmatpush.msrb.mxu1 %v174_v7  ;;  %628 = vmatpush.msrb.mxu0 %v175_v5 }
  0x25   :  { %275 = vmatpush.msra.mxu2 %v173_v8  ;;  %346 = vmatpush.msra.mxu3 %v173_v8 }
  0x26   :  { %200 = vmatpush.msrb.mxu1 %v173_v8  ;;  %629 = vmatpush.msrb.mxu0 %v174_v7 }
  0x27   :  { %485 = vmatpush.msrb.mxu2 %v176_v4  ;;  %201 = vmatmul.f32.vlgmr.msrb.gmra.mxu1 %v1773_v9 }
  0x28   :  { %556 = vmatpush.msrb.mxu3 %v176_v4  ;;  %414 = vmatpush.msra.mxu1 %v176_v4 }
  0x29   :  { %486 = vmatpush.msrb.mxu2 %v175_v5  ;;  %630 = vmatpush.msrb.mxu0 %v173_v8 }
  0x2a   :  { %557 = vmatpush.msrb.mxu3 %v175_v5  ;;  %415 = vmatpush.msra.mxu1 %v175_v5 }
  0x2b   :  { %487 = vmatpush.msrb.mxu2 %v174_v7 }
  0x2c   :  { %558 = vmatpush.msrb.mxu3 %v174_v7  ;;  %416 = vmatpush.msra.mxu1 %v174_v7 }
  0x2d   :  { %488 = vmatpush.msrb.mxu2 %v173_v8 }
  0x2e   :  { %559 = vmatpush.msrb.mxu3 %v173_v8  ;;  %417 = vmatpush.msra.mxu1 %v173_v8 }
  0x30   :  { %698 = vmatpush.msrb.mxu1 %v176_v4 }
  0x32   :  { %699 = vmatpush.msrb.mxu1 %v175_v5 }
  0x34   :  { %700 = vmatpush.msrb.mxu1 %v174_v7 }
  0x36   :  { %701 = vmatpush.msrb.mxu1 %v173_v8 }
  0x92   :  { %v1881_v15 = vpop.permute.xlu0 %225 }
  0x9c   :  { %v165_v11 = vpop.f32.mrf.mxu0  ;;  %v168_v12 = vpop.f32.mrf.mxu1 }
  0x9d   :  { %v166_v13 = vadd.f32 %v1486_v10, %v165_v11  ;;  %v169_v14 = vadd.f32 %v1486_v10, %v168_v12 }
  0x9f   :  { %171 = vst [vmem:[#allocation3] sm:$0xff] %v166_v13 }
  0xa0   :  { %172 = vst [vmem:[#allocation3 + $0x8] sm:$0xff] %v169_v14 }
  0xa4   :  { %v202_v16 = vpop.f32.mrf.mxu1 }
  0xa5   :  { %v228_v17 = vadd.f32 %v1881_v15, %v202_v16 }
  0xa6   :  { %v180_v18 = vld [vmem:[#allocation3] sm:$0x3]  ;;  %v257_v46 = vld [vmem:[#allocation3 + $0x2] sm:$0x3]  ;;  %v328_v11 = vld [vmem:[#allocation3 + $0x4] sm:$0x3] }
  0xa7   :  { %230 = vrot.lane.b32.xlu0 %v228_v17, %s1772_s28  ;;  %v205_v19 = vadd.f32 %v202_v16, %v180_v18 }
  0xa9   :  { %v1436_v20 = vmul.f32 -1.442695, %v205_v19 }
  0xab   :  { %1490 = vpow2.f32 %v1436_v20 }
  0xb1   :  { %v1491_v21 = vpop.eup %1490 }
  0xb2   :  { %v209_v22 = vadd.f32 1.0, %v1491_v21 }
  0xb4   :  { %1492 = vrcp.f32 %v209_v22  ;;  %v221_v28 = vand.u32 2147483648, %v209_v22  ;;  %vm215_vm2 = vweird.f32 %v209_v22  ;;  %v219_v29 = vand.u32 2147483647, %v209_v22 }
  0xb6   :  { %v222_v31 = vor.u32 1.1754944e-38, %v221_v28  ;;  %vm220_vm4 = vcmp.eq.f32.partialorder %v219_v29, 8.507059e+37 }
  0xba   :  { %v1493_v23 = vpop.eup %1492 }
  0xbb   :  { %v211_v24 = vmul.f32 %v1493_v23, %v209_v22  ;;  %vm216_vm1 = vweird.f32 %v1493_v23 }
  0xbc   :  { %vm217_vm3 = vmor %vm215_vm2, %vm216_vm1 }
  0xbd   :  { %v212_v25 = vsub.f32 1.0, %v211_v24 }
  0xbf   :  { %v213_v26 = vmul.f32 %v1493_v23, %v212_v25 }
  0xc1   :  { %v214_v27 = vadd.f32 %v1493_v23, %v213_v26 }
  0xc3   :  { %v218_v30 = vsel %vm217_vm3, %v1493_v23, %v214_v27 }
  0xc4   :  { %v223_v33 = vsel %vm220_vm4, %v222_v31, %v218_v30 }
 0x119   :  { %v231_v32 = vpop.permute.xlu0 %230 }
 0x11a   :  { %v233_v34 = vmul.f32 %v231_v32, %v223_v33 }
 0x11c   :  { %235 = vrot.lane.b32.xlu1 %v233_v34, %s1772_s28 }
 0x18e   :  { %v236_v35 = vpop.permute.xlu1 %235 }
 0x18f   :  { %v238_v36 = vadd.f32 %v236_v35, %v180_v18 }
 0x191   :  { %1494 = vtanh.f32 %v238_v36 }
 0x197   :  { %v1495_v37 = vpop.eup %1494 }
 0x198   :  { %v240_v38 = vsub.f32 0.0, %v1495_v37 }
 0x19a   :  { %242 = vrot.lane.b32.xlu1 %v240_v38, %s1774_s3 }
 0x20c   :  { %v243_v39 = vpop.permute.xlu1 %242 }
 0x20d   :  { %v245_v40 = vmul.f32 %v243_v39, %v223_v33 }
 0x20f   :  { %247 = vrot.lane.b32.xlu2 %v245_v40, %s1775_s30  ;;  %v399_v40 = vld [vmem:[#allocation3 + $0x6] sm:$0x3] }
 0x269   :  { %v248_v41 = vpop.permute.xlu2 %247 }
 0x26a   :  { %v250_v42 = vadd.f32 %v1495_v37, %v248_v41 }
 0x26c   :  { %252 = vrot.lane.b32.xlu2 %v250_v42, %s1772_s28 }
 0x2c6   :  { %v253_v43 = vpop.permute.xlu2 %252 }
 0x2c7   :  { %256 = vst.msk [vmem:[#allocation2] sm:$0x3] %vm255_vm5, %v253_v43  ;;  %1437 = vmatmul.msk.f32.vlgmr.msra.gmra.mxu2 %vm181_vm6, %v253_v43 }
 0x34a   :  { %v277_v44 = vpop.f32.mrf.mxu2 }
 0x34b   :  { %v300_v45 = vadd.f32 %v277_v44, %v1881_v15  ;;  %v280_v47 = vadd.f32 %v277_v44, %v257_v46 }
 0x34d   :  { %302 = vrot.lane.b32.xlu0 %v300_v45, %s1772_s28  ;;  %v1438_v48 = vmul.f32 -1.442695, %v280_v47 }
 0x34f   :  { %1496 = vpow2.f32 %v1438_v48 }
 0x355   :  { %v1497_v49 = vpop.eup %1496 }
 0x356   :  { %v284_v50 = vadd.f32 1.0, %v1497_v49 }
 0x358   :  { %1498 = vrcp.f32 %v284_v50  ;;  %v296_v56 = vand.u32 2147483648, %v284_v50  ;;  %vm290_vm8 = vweird.f32 %v284_v50  ;;  %v294_v57 = vand.u32 2147483647, %v284_v50 }
 0x35a   :  { %v297_v59 = vor.u32 1.1754944e-38, %v296_v56  ;;  %vm295_vm10 = vcmp.eq.f32.partialorder %v294_v57, 8.507059e+37 }
 0x35e   :  { %v1499_v51 = vpop.eup %1498 }
 0x35f   :  { %v286_v52 = vmul.f32 %v1499_v51, %v284_v50  ;;  %vm291_vm7 = vweird.f32 %v1499_v51 }
 0x360   :  { %vm292_vm9 = vmor %vm290_vm8, %vm291_vm7 }
 0x361   :  { %v287_v53 = vsub.f32 1.0, %v286_v52 }
 0x363   :  { %v288_v54 = vmul.f32 %v1499_v51, %v287_v53 }
 0x365   :  { %v289_v55 = vadd.f32 %v1499_v51, %v288_v54 }
 0x367   :  { %v293_v58 = vsel %vm292_vm9, %v1499_v51, %v289_v55 }
 0x368   :  { %v298_v61 = vsel %vm295_vm10, %v297_v59, %v293_v58 }
 0x3bf   :  { %v303_v60 = vpop.permute.xlu0 %302 }
 0x3c0   :  { %v305_v62 = vmul.f32 %v303_v60, %v298_v61 }
 0x3c2   :  { %307 = vrot.lane.b32.xlu1 %v305_v62, %s1772_s28 }
 0x434   :  { %v308_v63 = vpop.permute.xlu1 %307 }
 0x435   :  { %v310_v0 = vadd.f32 %v308_v63, %v257_v46 }
 0x437   :  { %1500 = vtanh.f32 %v310_v0 }
 0x43d   :  { %v1501_v1 = vpop.eup %1500 }
 0x43e   :  { %v312_v2 = vsub.f32 %v250_v42, %v1501_v1 }
 0x440   :  { %314 = vrot.lane.b32.xlu2 %v312_v2, %s1774_s3  ;;  %v758_v2 = vld [vmem:[#allocation10 + $0x10] sm:$0xff] }
 0x49a   :  { %v315_v3 = vpop.permute.xlu2 %314 }
 0x49b   :  { %v317_v4 = vmul.f32 %v315_v3, %v298_v61  ;;  %v757_v3 = vld [vmem:[#allocation10 + $0x8] sm:$0xff] }
 0x49d   :  { %319 = vrot.lane.b32.xlu0 %v317_v4, %s1775_s30  ;;  %v756_v4 = vld [vmem:[#allocation10] sm:$0xff] }
 0x50f   :  { %v320_v5 = vpop.permute.xlu0 %319 }
 0x510   :  { %v322_v6 = vadd.f32 %v1501_v1, %v320_v5  ;;  %v759_v1 = vld [vmem:[#allocation10 + $0x18] sm:$0xff] }
 0x511   :  { %782 = vmatpush.msra.mxu2 %v759_v1 }
 0x512   :  { %324 = vrot.lane.b32.xlu1 %v322_v6, %s1772_s28 }
 0x513   :  { %783 = vmatpush.msra.mxu2 %v758_v2 }
 0x515   :  { %784 = vmatpush.msra.mxu2 %v757_v3 }
 0x517   :  { %785 = vmatpush.msra.mxu2 %v756_v4 }
 0x584   :  { %v325_v7 = vpop.permute.xlu1 %324 }
 0x585   :  { %327 = vst.msk [vmem:[#allocation2 + $0x2] sm:$0x3] %vm255_vm5, %v325_v7  ;;  %1439 = vmatmul.msk.f32.vlgmr.msra.gmra.mxu3 %vm181_vm6, %v325_v7 }
 0x608   :  { %v348_v8 = vpop.f32.mrf.mxu3 }
 0x609   :  { %v371_v10 = vadd.f32 %v348_v8, %v1881_v15  ;;  %v351_v12 = vadd.f32 %v348_v8, %v328_v11 }
 0x60b   :  { %373 = vrot.lane.b32.xlu2 %v371_v10, %s1772_s28  ;;  %v1440_v13 = vmul.f32 -1.442695, %v351_v12  ;;  %v1921_v10 = vld [vmem:[%s2103_s7] ss:$0 sm:$0xff] }
 0x60d   :  { %1502 = vpow2.f32 %v1440_v13  ;;  %v470_v13 = vld [vmem:[#allocation3 + $0x8] sm:$0x3] }
 0x613   :  { %v1503_v14 = vpop.eup %1502 }
 0x614   :  { %v355_v16 = vadd.f32 1.0, %v1503_v14 }
 0x616   :  { %1504 = vrcp.f32 %v355_v16  ;;  %v367_v22 = vand.u32 2147483648, %v355_v16  ;;  %vm361_vm12 = vweird.f32 %v355_v16  ;;  %v365_v23 = vand.u32 2147483647, %v355_v16 }
 0x618   :  { %v368_v25 = vor.u32 1.1754944e-38, %v367_v22  ;;  %vm366_vm14 = vcmp.eq.f32.partialorder %v365_v23, 8.507059e+37 }
 0x61c   :  { %v1505_v17 = vpop.eup %1504 }
 0x61d   :  { %v357_v18 = vmul.f32 %v1505_v17, %v355_v16  ;;  %vm362_vm11 = vweird.f32 %v1505_v17 }
 0x61e   :  { %vm363_vm13 = vmor %vm361_vm12, %vm362_vm11 }
 0x61f   :  { %v358_v19 = vsub.f32 1.0, %v357_v18 }
 0x621   :  { %v359_v20 = vmul.f32 %v1505_v17, %v358_v19 }
 0x623   :  { %v360_v21 = vadd.f32 %v1505_v17, %v359_v20 }
 0x625   :  { %v364_v24 = vsel %vm363_vm13, %v1505_v17, %v360_v21 }
 0x626   :  { %v369_v27 = vsel %vm366_vm14, %v368_v25, %v364_v24 }
 0x665   :  { %v374_v26 = vpop.permute.xlu2 %373 }
 0x666   :  { %v376_v28 = vmul.f32 %v374_v26, %v369_v27 }
 0x668   :  { %378 = vrot.lane.b32.xlu0 %v376_v28, %s1772_s28 }
 0x6da   :  { %v379_v29 = vpop.permute.xlu0 %378 }
 0x6db   :  { %v381_v30 = vadd.f32 %v379_v29, %v328_v11 }
 0x6dd   :  { %1506 = vtanh.f32 %v381_v30 }
 0x6e3   :  { %v1507_v31 = vpop.eup %1506 }
 0x6e4   :  { %v383_v32 = vsub.f32 %v322_v6, %v1507_v31 }
 0x6e6   :  { %385 = vrot.lane.b32.xlu1 %v383_v32, %s1774_s3 }
 0x758   :  { %v386_v33 = vpop.permute.xlu1 %385 }
 0x759   :  { %v388_v34 = vmul.f32 %v386_v33, %v369_v27 }
 0x75b   :  { %390 = vrot.lane.b32.xlu2 %v388_v34, %s1775_s30 }
 0x7b5   :  { %v391_v35 = vpop.permute.xlu2 %390 }
 0x7b6   :  { %v393_v36 = vadd.f32 %v1507_v31, %v391_v35 }
 0x7b8   :  { %395 = vrot.lane.b32.xlu0 %v393_v36, %s1772_s28 }
 0x82a   :  { %v396_v37 = vpop.permute.xlu0 %395 }
 0x82b   :  { %398 = vst.msk [vmem:[#allocation2 + $0x4] sm:$0x3] %vm255_vm5, %v396_v37  ;;  %1441 = vmatmul.msk.f32.vlgmr.msra.gmra.mxu1 %vm181_vm6, %v396_v37 }
 0x8a8   :  { %v419_v38 = vpop.f32.mrf.mxu1 }
 0x8a9   :  { %v442_v39 = vadd.f32 %v419_v38, %v1881_v15  ;;  %v422_v41 = vadd.f32 %v419_v38, %v399_v40 }
 0x8ab   :  { %444 = vrot.lane.b32.xlu1 %v442_v39, %s1772_s28  ;;  %v1442_v42 = vmul.f32 -1.442695, %v422_v41  ;;  %v1931_v39 = vld [vmem:[#allocation12 + $0x18] sm:$0xff]  ;;  %v1937_v41 = vld [vmem:[#allocation12 + $0x8] sm:$0xff] }
 0x8ac   :  { %815 = vmatpush.msra.mxu3 %v1931_v39  ;;  %889 = vmatpush.msra.mxu0 %v1931_v39 }
 0x8ad   :  { %1508 = vpow2.f32 %v1442_v42  ;;  %960 = vmatpush.msra.mxu1 %v1931_v39  ;;  %v1943_v42 = vld [vmem:[#allocation12] sm:$0xff] }
 0x8b3   :  { %v1509_v43 = vpop.eup %1508 }
 0x8b4   :  { %v426_v44 = vadd.f32 1.0, %v1509_v43  ;;  %v1488_v43 = vld [vmem:[%s2104_s8] ss:$0 sm:$0xff] }
 0x8b6   :  { %1510 = vrcp.f32 %v426_v44  ;;  %v438_v50 = vand.u32 2147483648, %v426_v44  ;;  %vm432_vm0 = vweird.f32 %v426_v44  ;;  %v436_v51 = vand.u32 2147483647, %v426_v44 }
 0x8b8   :  { %v439_v53 = vor.u32 1.1754944e-38, %v438_v50  ;;  %vm437_vm2 = vcmp.eq.f32.partialorder %v436_v51, 8.507059e+37 }
 0x8bc   :  { %v1511_v45 = vpop.eup %1510 }
 0x8bd   :  { %v428_v46 = vmul.f32 %v1511_v45, %v426_v44  ;;  %vm433_vm15 = vweird.f32 %v1511_v45 }
 0x8be   :  { %vm434_vm1 = vmor %vm432_vm0, %vm433_vm15 }
 0x8bf   :  { %v429_v47 = vsub.f32 1.0, %v428_v46 }
 0x8c1   :  { %v430_v48 = vmul.f32 %v1511_v45, %v429_v47 }
 0x8c3   :  { %v431_v49 = vadd.f32 %v1511_v45, %v430_v48 }
 0x8c5   :  { %v435_v52 = vsel %vm434_vm1, %v1511_v45, %v431_v49 }
 0x8c6   :  { %v440_v55 = vsel %vm437_vm2, %v439_v53, %v435_v52 }
 0x91d   :  { %v445_v54 = vpop.permute.xlu1 %444 }
 0x91e   :  { %v447_v56 = vmul.f32 %v445_v54, %v440_v55 }
 0x920   :  { %449 = vrot.lane.b32.xlu2 %v447_v56, %s1772_s28 }
 0x97a   :  { %v450_v57 = vpop.permute.xlu2 %449 }
 0x97b   :  { %v452_v58 = vadd.f32 %v450_v57, %v399_v40  ;;  %v1933_v40 = vld [vmem:[#allocation12 + $0x10] sm:$0xff] }
 0x97c   :  { %816 = vmatpush.msra.mxu3 %v1933_v40  ;;  %890 = vmatpush.msra.mxu0 %v1933_v40 }
 0x97d   :  { %1512 = vtanh.f32 %v452_v58  ;;  %961 = vmatpush.msra.mxu1 %v1933_v40 }
 0x97e   :  { %817 = vmatpush.msra.mxu3 %v1937_v41  ;;  %891 = vmatpush.msra.mxu0 %v1937_v41 }
 0x97f   :  { %962 = vmatpush.msra.mxu1 %v1937_v41 }
 0x980   :  { %818 = vmatpush.msra.mxu3 %v1943_v42  ;;  %892 = vmatpush.msra.mxu0 %v1943_v42 }
 0x981   :  { %963 = vmatpush.msra.mxu1 %v1943_v42 }
 0x983   :  { %v1513_v59 = vpop.eup %1512 }
 0x984   :  { %v454_v60 = vsub.f32 %v393_v36, %v1513_v59 }
 0x986   :  { %456 = vrot.lane.b32.xlu0 %v454_v60, %s1774_s3 }
 0x9f8   :  { %v457_v61 = vpop.permute.xlu0 %456 }
 0x9f9   :  { %v459_v62 = vmul.f32 %v457_v61, %v440_v55 }
 0x9fb   :  { %461 = vrot.lane.b32.xlu1 %v459_v62, %s1775_s30 }
 0xa6d   :  { %v462_v63 = vpop.permute.xlu1 %461 }
 0xa6e   :  { %v464_v0 = vadd.f32 %v1513_v59, %v462_v63 }
 0xa70   :  { %466 = vrot.lane.b32.xlu2 %v464_v0, %s1772_s28 }
 0xaca   :  { %v467_v5 = vpop.permute.xlu2 %466 }
 0xacb   :  { %469 = vst.msk [vmem:[#allocation2 + $0x6] sm:$0x3] %vm255_vm5, %v467_v5  ;;  %1443 = vmatmul.msk.f32.vlgmr.msrb.gmra.mxu2 %vm181_vm6, %v467_v5 }
 0xacc   :  { %1244 = vmatpush.msrb.mxu2 %v1931_v39 }
 0xace   :  { %1245 = vmatpush.msrb.mxu2 %v1933_v40 }
 0xad0   :  { %1246 = vmatpush.msrb.mxu2 %v1937_v41 }
 0xad2   :  { %v754_v6 = vld [vmem:[#allocation2] sm:$0xff]  ;;  %1247 = vmatpush.msrb.mxu2 %v1943_v42 }
 0xad3   :  { %1451 = vmatmul.msk.f32.vlgmr.msra.gmra.mxu2 %vm181_vm6, %v754_v6 }
 0xb4e   :  { %v490_v7 = vpop.f32.mrf.mxu2 }
 0xb4f   :  { %v513_v8 = vadd.f32 %v490_v7, %v1881_v15  ;;  %v493_v14 = vadd.f32 %v490_v7, %v470_v13 }
 0xb51   :  { %515 = vrot.lane.b32.xlu0 %v513_v8, %s1772_s28  ;;  %v1444_v16 = vmul.f32 -1.442695, %v493_v14 }
 0xb53   :  { %1514 = vpow2.f32 %v1444_v16 }
 0xb56   :  { %v787_v11 = vpop.f32.mrf.mxu2 }
 0xb57   :  { %v788_v12 = vadd.f32 %v1921_v10, %v787_v11 }
 0xb59   :  { %793 = vst [vmem:[#allocation3] sm:$0xff] %v788_v12  ;;  %v1515_v17 = vpop.eup %1514 }
 0xb5a   :  { %v497_v18 = vadd.f32 1.0, %v1515_v17 }
 0xb5c   :  { %1516 = vrcp.f32 %v497_v18  ;;  %v509_v24 = vand.u32 2147483648, %v497_v18  ;;  %vm503_vm4 = vweird.f32 %v497_v18  ;;  %v507_v25 = vand.u32 2147483647, %v497_v18 }
 0xb5e   :  { %v510_v27 = vor.u32 1.1754944e-38, %v509_v24  ;;  %vm508_vm8 = vcmp.eq.f32.partialorder %v507_v25, 8.507059e+37 }
 0xb60   :  { %v802_v52 = vld [vmem:[#allocation3] sm:$0x3] }
 0xb62   :  { %v1517_v19 = vpop.eup %1516 }
 0xb63   :  { %v499_v20 = vmul.f32 %v1517_v19, %v497_v18  ;;  %vm504_vm3 = vweird.f32 %v1517_v19 }
 0xb64   :  { %vm505_vm7 = vmor %vm503_vm4, %vm504_vm3 }
 0xb65   :  { %v500_v21 = vsub.f32 1.0, %v499_v20 }
 0xb67   :  { %v501_v22 = vmul.f32 %v1517_v19, %v500_v21 }
 0xb69   :  { %v502_v23 = vadd.f32 %v1517_v19, %v501_v22 }
 0xb6b   :  { %v506_v26 = vsel %vm505_vm7, %v1517_v19, %v502_v23 }
 0xb6c   :  { %v511_v29 = vsel %vm508_vm8, %v510_v27, %v506_v26 }
 0xbc3   :  { %v516_v28 = vpop.permute.xlu0 %515 }
 0xbc4   :  { %v518_v30 = vmul.f32 %v516_v28, %v511_v29 }
 0xbc6   :  { %520 = vrot.lane.b32.xlu1 %v518_v30, %s1772_s28 }
 0xc38   :  { %v521_v31 = vpop.permute.xlu1 %520 }
 0xc39   :  { %v523_v32 = vadd.f32 %v521_v31, %v470_v13 }
 0xc3b   :  { %1518 = vtanh.f32 %v523_v32 }
 0xc41   :  { %v1519_v33 = vpop.eup %1518 }
 0xc42   :  { %v525_v34 = vsub.f32 %v464_v0, %v1519_v33 }
 0xc44   :  { %527 = vrot.lane.b32.xlu2 %v525_v34, %s1774_s3 }
 0xc4c   :  { %843 = vrot.lane.b32.xlu2 %v1488_v43, %s1772_s28 }
 0xc9e   :  { %v528_v35 = vpop.permute.xlu2 %527 }
 0xc9f   :  { %v530_v36 = vmul.f32 %v528_v35, %v511_v29 }
 0xca1   :  { %532 = vrot.lane.b32.xlu0 %v530_v36, %s1775_s30 }
 0xca6   :  { %v1972_v47 = vpop.permute.xlu2 %843 }
 0xd13   :  { %v533_v37 = vpop.permute.xlu0 %532 }
 0xd14   :  { %v1927_v38 = vadd.f32 %v1519_v33, %v533_v37 }
 0xd16   :  { %537 = vrot.lane.b32.xlu1 %v1927_v38, %s1772_s28 }
 0xd88   :  { %v538_v44 = vpop.permute.xlu1 %537 }
 0xd89   :  { %540 = vst.msk [vmem:[#allocation2 + $0x8] sm:$0x3] %vm255_vm5, %v538_v44  ;;  %1445 = vmatmul.msk.f32.vlgmr.msrb.gmra.mxu3 %vm181_vm6, %v538_v44 }
 0xd8a   :  { %1031 = vmatpush.msrb.mxu3 %v1931_v39 }
 0xd8c   :  { %1032 = vmatpush.msrb.mxu3 %v1933_v40 }
 0xd8e   :  { %1033 = vmatpush.msrb.mxu3 %v1937_v41 }
 0xd90   :  { %1034 = vmatpush.msrb.mxu3 %v1943_v42 }
 0xd91   :  { %819 = vmatmul.f32.vlgmr.msra.gmra.mxu3 %v1773_v9  ;;  %v541_v9 = vld [vmem:[#allocation3 + $0xa] sm:$0x3] }
 0xd92   :  { %1315 = vmatpush.msra.mxu3 %v1931_v39 }
 0xd94   :  { %1316 = vmatpush.msra.mxu3 %v1933_v40 }
 0xd96   :  { %1317 = vmatpush.msra.mxu3 %v1937_v41 }
 0xd98   :  { %1318 = vmatpush.msra.mxu3 %v1943_v42 }
 0xe0c   :  { %v561_v45 = vpop.f32.mrf.mxu3 }
 0xe0d   :  { %v584_v46 = vadd.f32 %v561_v45, %v1881_v15  ;;  %v564_v50 = vadd.f32 %v561_v45, %v541_v9 }
 0xe0f   :  { %586 = vrot.lane.b32.xlu0 %v584_v46, %s1772_s28  ;;  %v1446_v51 = vmul.f32 -1.442695, %v564_v50 }
 0xe11   :  { %1520 = vpow2.f32 %v1446_v51  ;;  %v874_v51 = vld [vmem:[#allocation3 + $0x2] sm:$0x3] }
 0xe14   :  { %v820_v48 = vpop.f32.mrf.mxu3 }
 0xe15   :  { %v846_v49 = vadd.f32 %v1972_v47, %v820_v48  ;;  %v823_v53 = vadd.f32 %v820_v48, %v802_v52 }
 0xe17   :  { %848 = vrot.lane.b32.xlu1 %v846_v49, %s1772_s28  ;;  %v1453_v54 = vmul.f32 -1.442695, %v823_v53  ;;  %v1521_v55 = vpop.eup %1520  ;;  %v612_v49 = vld [vmem:[#allocation3 + $0xc] sm:$0x3] }
 0xe18   :  { %v568_v56 = vadd.f32 1.0, %v1521_v55 }
 0xe19   :  { %1522 = vpow2.f32 %v1453_v54 }
 0xe1a   :  { %1524 = vrcp.f32 %v568_v56  ;;  %v580_v3 = vand.u32 2147483648, %v568_v56  ;;  %vm574_vm10 = vweird.f32 %v568_v56  ;;  %v578_v4 = vand.u32 2147483647, %v568_v56 }
 0xe1c   :  { %v581_v7 = vor.u32 1.1754944e-38, %v580_v3  ;;  %vm579_vm12 = vcmp.eq.f32.partialorder %v578_v4, 8.507059e+37 }
 0xe1f   :  { %v1523_v57 = vpop.eup %1522 }
 0xe20   :  { %v827_v58 = vadd.f32 1.0, %v1523_v57  ;;  %v1525_v59 = vpop.eup %1524 }
 0xe21   :  { %v570_v60 = vmul.f32 %v1525_v59, %v568_v56  ;;  %vm575_vm9 = vweird.f32 %v1525_v59 }
 0xe22   :  { %1526 = vrcp.f32 %v827_v58  ;;  %vm576_vm11 = vmor %vm574_vm10, %vm575_vm9  ;;  %v839_v14 = vand.u32 2147483648, %v827_v58  ;;  %vm833_vm14 = vweird.f32 %v827_v58  ;;  %v837_v16 = vand.u32 2147483647, %v827_v58 }
 0xe23   :  { %v571_v61 = vsub.f32 1.0, %v570_v60 }
 0xe24   :  { %v840_v18 = vor.u32 1.1754944e-38, %v839_v14  ;;  %vm838_vm0 = vcmp.eq.f32.partialorder %v837_v16, 8.507059e+37 }
 0xe25   :  { %v572_v63 = vmul.f32 %v1525_v59, %v571_v61 }
 0xe27   :  { %v573_v1 = vadd.f32 %v1525_v59, %v572_v63 }
 0xe28   :  { %v1527_v62 = vpop.eup %1526 }
 0xe29   :  { %v829_v0 = vmul.f32 %v1527_v62, %v827_v58  ;;  %v577_v5 = vsel %vm576_vm11, %v1525_v59, %v573_v1  ;;  %vm834_vm13 = vweird.f32 %v1527_v62 }
 0xe2a   :  { %v582_v11 = vsel %vm579_vm12, %v581_v7, %v577_v5  ;;  %vm835_vm15 = vmor %vm833_vm14, %vm834_vm13 }
 0xe2b   :  { %v830_v2 = vsub.f32 1.0, %v829_v0 }
 0xe2d   :  { %v831_v6 = vmul.f32 %v1527_v62, %v830_v2 }
 0xe2f   :  { %v832_v13 = vadd.f32 %v1527_v62, %v831_v6 }
 0xe31   :  { %v836_v17 = vsel %vm835_vm15, %v1527_v62, %v832_v13 }
 0xe32   :  { %v841_v20 = vsel %vm838_vm0, %v840_v18, %v836_v17 }
 0xe81   :  { %v587_v8 = vpop.permute.xlu0 %586 }
 0xe82   :  { %v589_v12 = vmul.f32 %v587_v8, %v582_v11 }
 0xe84   :  { %591 = vrot.lane.b32.xlu2 %v589_v12, %s1772_s28 }
 0xe89   :  { %v849_v19 = vpop.permute.xlu1 %848 }
 0xe8a   :  { %v851_v21 = vmul.f32 %v849_v19, %v841_v20 }
 0xe8c   :  { %853 = vrot.lane.b32.xlu0 %v851_v21, %s1772_s28 }
 0xede   :  { %v592_v22 = vpop.permute.xlu2 %591 }
 0xedf   :  { %v594_v23 = vadd.f32 %v592_v22, %v541_v9 }
 0xee1   :  { %1528 = vtanh.f32 %v594_v23 }
 0xee7   :  { %v1529_v24 = vpop.eup %1528 }
 0xee8   :  { %v596_v25 = vsub.f32 %v1927_v38, %v1529_v24 }
 0xeea   :  { %598 = vrot.lane.b32.xlu1 %v596_v25, %s1774_s3 }
 0xefe   :  { %v854_v26 = vpop.permute.xlu0 %853 }
 0xeff   :  { %v856_v27 = vadd.f32 %v854_v26, %v802_v52 }
 0xf01   :  { %1530 = vtanh.f32 %v856_v27 }
 0xf07   :  { %v1531_v28 = vpop.eup %1530 }
 0xf08   :  { %v858_v29 = vsub.f32 0.0, %v1531_v28 }
 0xf0a   :  { %860 = vrot.lane.b32.xlu2 %v858_v29, %s1774_s3 }
 0xf5c   :  { %v599_v30 = vpop.permute.xlu1 %598 }
 0xf5d   :  { %v601_v31 = vmul.f32 %v599_v30, %v582_v11 }
 0xf5f   :  { %603 = vrot.lane.b32.xlu0 %v601_v31, %s1775_s30 }
 0xf64   :  { %v861_v32 = vpop.permute.xlu2 %860 }
 0xf65   :  { %v863_v33 = vmul.f32 %v861_v32, %v841_v20 }
 0xf67   :  { %865 = vrot.lane.b32.xlu1 %v863_v33, %s1775_s30 }
 0xfd1   :  { %v604_v34 = vpop.permute.xlu0 %603 }
 0xfd2   :  { %v1983_v35 = vadd.f32 %v1529_v24, %v604_v34 }
 0xfd4   :  { %608 = vrot.lane.b32.xlu2 %v1983_v35, %s1772_s28 }
 0xfd9   :  { %v866_v36 = vpop.permute.xlu1 %865 }
 0xfda   :  { %v1987_v37 = vadd.f32 %v1531_v28, %v866_v36 }
 0xfdc   :  { %870 = vrot.lane.b32.xlu0 %v1987_v37, %s1772_s28 }
0x102e   :  { %v609_v38 = vpop.permute.xlu2 %608 }
0x102f   :  { %611 = vst.msk [vmem:[#allocation2 + $0xa] sm:$0x3] %vm255_vm5, %v609_v38  ;;  %1447 = vmatmul.msk.f32.vlgmr.msrb.gmra.mxu0 %vm181_vm6, %v609_v38 }
0x1030   :  { %1102 = vmatpush.msrb.mxu0 %v1931_v39 }
0x1032   :  { %1103 = vmatpush.msrb.mxu0 %v1933_v40 }
0x1034   :  { %1104 = vmatpush.msrb.mxu0 %v1937_v41 }
0x1036   :  { %1105 = vmatpush.msrb.mxu0 %v1943_v42 }
0x104e   :  { %v871_v43 = vpop.permute.xlu0 %870 }
0x104f   :  { %873 = vst.msk [vmem:[#allocation2] sm:$0x3] %vm255_vm5, %v871_v43  ;;  %1454 = vmatmul.msk.f32.vlgmr.msra.gmra.mxu0 %vm181_vm6, %v871_v43 }
0x10ac   :  { %v632_v44 = vpop.f32.mrf.mxu0 }
0x10ad   :  { %v655_v45 = vadd.f32 %v632_v44, %v1881_v15  ;;  %v635_v9 = vadd.f32 %v632_v44, %v612_v49 }
0x10af   :  { %657 = vrot.lane.b32.xlu1 %v655_v45, %s1772_s28  ;;  %v1448_v50 = vmul.f32 -1.442695, %v635_v9 }
0x10b1   :  { %1532 = vpow2.f32 %v1448_v50 }
0x10b7   :  { %v1533_v54 = vpop.eup %1532 }
0x10b8   :  { %v639_v55 = vadd.f32 1.0, %v1533_v54 }
0x10ba   :  { %v651_v2 = vand.u32 2147483648, %v639_v55  ;;  %vm645_vm2 = vweird.f32 %v639_v55  ;;  %v649_v3 = vand.u32 2147483647, %v639_v55 }
0x10bc   :  { %v652_v6 = vor.u32 1.1754944e-38, %v651_v2  ;;  %vm650_vm4 = vcmp.eq.f32.partialorder %v649_v3, 8.507059e+37  ;;  %v683_v2 = vld [vmem:[#allocation3 + $0xe] sm:$0x3] }
0x10cc   :  { %v894_v46 = vpop.f32.mrf.mxu0 }
0x10cd   :  { %v917_v48 = vadd.f32 %v894_v46, %v1972_v47  ;;  %v897_v52 = vadd.f32 %v894_v46, %v874_v51  ;;  %v945_v46 = vld [vmem:[#allocation3 + $0x4] sm:$0x3] }
0x10cf   :  { %919 = vrot.lane.b32.xlu2 %v917_v48, %s1772_s28  ;;  %v1455_v53 = vmul.f32 -1.442695, %v897_v52 }
0x10d1   :  { %1534 = vpow2.f32 %v1455_v53 }
0x10d2   :  { %1536 = vrcp.f32 %v639_v55 }
0x10d7   :  { %v1535_v56 = vpop.eup %1534 }
0x10d8   :  { %v901_v57 = vadd.f32 1.0, %v1535_v56  ;;  %v1537_v58 = vpop.eup %1536 }
0x10d9   :  { %v641_v59 = vmul.f32 %v1537_v58, %v639_v55  ;;  %vm646_vm1 = vweird.f32 %v1537_v58 }
0x10da   :  { %1538 = vrcp.f32 %v901_v57  ;;  %vm647_vm3 = vmor %vm645_vm2, %vm646_vm1  ;;  %v913_v13 = vand.u32 2147483648, %v901_v57  ;;  %vm907_vm8 = vweird.f32 %v901_v57  ;;  %v911_v14 = vand.u32 2147483647, %v901_v57 }
0x10db   :  { %v642_v60 = vsub.f32 1.0, %v641_v59 }
0x10dc   :  { %v914_v17 = vor.u32 1.1754944e-38, %v913_v13  ;;  %vm912_vm10 = vcmp.eq.f32.partialorder %v911_v14, 8.507059e+37 }
0x10dd   :  { %v643_v62 = vmul.f32 %v1537_v58, %v642_v60 }
0x10df   :  { %v644_v0 = vadd.f32 %v1537_v58, %v643_v62 }
0x10e0   :  { %v1539_v61 = vpop.eup %1538 }
0x10e1   :  { %v903_v63 = vmul.f32 %v1539_v61, %v901_v57  ;;  %v648_v4 = vsel %vm647_vm3, %v1537_v58, %v644_v0  ;;  %vm908_vm7 = vweird.f32 %v1539_v61 }
0x10e2   :  { %v653_v8 = vsel %vm650_vm4, %v652_v6, %v648_v4  ;;  %vm909_vm9 = vmor %vm907_vm8, %vm908_vm7 }
0x10e3   :  { %v904_v1 = vsub.f32 1.0, %v903_v63 }
0x10e5   :  { %v905_v5 = vmul.f32 %v1539_v61, %v904_v1 }
0x10e7   :  { %v906_v12 = vadd.f32 %v1539_v61, %v905_v5 }
0x10e9   :  { %v910_v16 = vsel %vm909_vm9, %v1539_v61, %v906_v12 }
0x10ea   :  { %v915_v19 = vsel %vm912_vm10, %v914_v17, %v910_v16 }
0x1121   :  { %v658_v7 = vpop.permute.xlu1 %657 }
0x1122   :  { %v660_v11 = vmul.f32 %v658_v7, %v653_v8 }
0x1124   :  { %662 = vrot.lane.b32.xlu0 %v660_v11, %s1772_s28 }
0x1129   :  { %v920_v18 = vpop.permute.xlu2 %919 }
0x112a   :  { %v922_v20 = vmul.f32 %v920_v18, %v915_v19 }
0x112c   :  { %924 = vrot.lane.b32.xlu1 %v922_v20, %s1772_s28 }
0x1196   :  { %v663_v21 = vpop.permute.xlu0 %662 }
0x1197   :  { %v665_v22 = vadd.f32 %v663_v21, %v612_v49 }
0x1199   :  { %1540 = vtanh.f32 %v665_v22 }
0x119e   :  { %v925_v23 = vpop.permute.xlu1 %924 }
0x119f   :  { %v1541_v24 = vpop.eup %1540  ;;  %v927_v25 = vadd.f32 %v925_v23, %v874_v51 }
0x11a0   :  { %v667_v26 = vsub.f32 %v1983_v35, %v1541_v24 }
0x11a1   :  { %1542 = vtanh.f32 %v927_v25 }
0x11a2   :  { %669 = vrot.lane.b32.xlu2 %v667_v26, %s1774_s3 }
0x11a7   :  { %v1543_v27 = vpop.eup %1542 }
0x11a8   :  { %v929_v28 = vsub.f32 %v1987_v37, %v1543_v27 }
0x11aa   :  { %931 = vrot.lane.b32.xlu0 %v929_v28, %s1774_s3 }
0x11fc   :  { %v670_v29 = vpop.permute.xlu2 %669 }
0x11fd   :  { %v672_v30 = vmul.f32 %v670_v29, %v653_v8 }
0x11ff   :  { %674 = vrot.lane.b32.xlu1 %v672_v30, %s1775_s30  ;;  %v1016_v30 = vld [vmem:[#allocation3 + $0x6] sm:$0x3] }
0x121c   :  { %v932_v31 = vpop.permute.xlu0 %931 }
0x121d   :  { %v934_v32 = vmul.f32 %v932_v31, %v915_v19 }
0x121f   :  { %936 = vrot.lane.b32.xlu2 %v934_v32, %s1775_s30 }
0x1271   :  { %v675_v33 = vpop.permute.xlu1 %674 }
0x1272   :  { %v2011_v34 = vadd.f32 %v1541_v24, %v675_v33 }
0x1274   :  { %679 = vrot.lane.b32.xlu0 %v2011_v34, %s1772_s28 }
0x1279   :  { %v937_v35 = vpop.permute.xlu2 %936 }
0x127a   :  { %v939_v36 = vadd.f32 %v1543_v27, %v937_v35 }
0x127c   :  { %941 = vrot.lane.b32.xlu1 %v939_v36, %s1772_s28 }
0x12e6   :  { %v680_v37 = vpop.permute.xlu0 %679 }
0x12e7   :  { %682 = vst.msk [vmem:[#allocation2 + $0xc] sm:$0x3] %vm255_vm5, %v680_v37  ;;  %1449 = vmatmul.msk.f32.vlgmr.msrb.gmra.mxu1 %vm181_vm6, %v680_v37 }
0x12e8   :  { %1173 = vmatpush.msrb.mxu1 %v1931_v39 }
0x12ea   :  { %1174 = vmatpush.msrb.mxu1 %v1933_v40 }
0x12ec   :  { %1175 = vmatpush.msrb.mxu1 %v1937_v41 }
0x12ee   :  { %v942_v38 = vpop.permute.xlu1 %941  ;;  %1176 = vmatpush.msrb.mxu1 %v1943_v42 }
0x12ef   :  { %944 = vst.msk [vmem:[#allocation2 + $0x2] sm:$0x3] %vm255_vm5, %v942_v38  ;;  %1456 = vmatmul.msk.f32.vlgmr.msra.gmra.mxu1 %vm181_vm6, %v942_v38 }
0x1364   :  { %v703_v43 = vpop.f32.mrf.mxu1 }
0x1365   :  { %v726_v63 = vadd.f32 %v703_v43, %v1881_v15  ;;  %v706_v3 = vadd.f32 %v703_v43, %v683_v2 }
0x1367   :  { %v1450_v4 = vmul.f32 -1.442695, %v706_v3 }
0x136c   :  { %v965_v44 = vpop.f32.mrf.mxu1 }
0x136d   :  { %v988_v45 = vadd.f32 %v965_v44, %v1972_v47  ;;  %v968_v48 = vadd.f32 %v965_v44, %v945_v46 }
0x136f   :  { %990 = vrot.lane.b32.xlu2 %v988_v45, %s1772_s28  ;;  %v1457_v39 = vmul.f32 -1.442695, %v968_v48 }
0x1371   :  { %1544 = vpow2.f32 %v1457_v39 }
0x1377   :  { %v1545_v40 = vpop.eup %1544 }
0x1378   :  { %v972_v49 = vadd.f32 1.0, %v1545_v40 }
0x137a   :  { %1546 = vrcp.f32 %v972_v49  ;;  %v984_v52 = vand.u32 2147483648, %v972_v49  ;;  %vm978_vm12 = vweird.f32 %v972_v49  ;;  %v982_v53 = vand.u32 2147483647, %v972_v49 }
0x137c   :  { %v985_v55 = vor.u32 1.1754944e-38, %v984_v52  ;;  %vm983_vm14 = vcmp.eq.f32.partialorder %v982_v53, 8.507059e+37 }
0x1380   :  { %v1547_v41 = vpop.eup %1546 }
0x1381   :  { %v974_v9 = vmul.f32 %v1547_v41, %v972_v49  ;;  %vm979_vm11 = vweird.f32 %v1547_v41 }
0x1382   :  { %vm980_vm13 = vmor %vm978_vm12, %vm979_vm11 }
0x1383   :  { %v975_v42 = vsub.f32 1.0, %v974_v9 }
0x1385   :  { %v976_v50 = vmul.f32 %v1547_v41, %v975_v42 }
0x1387   :  { %v977_v51 = vadd.f32 %v1547_v41, %v976_v50 }
0x1389   :  { %v981_v54 = vsel %vm980_vm13, %v1547_v41, %v977_v51 }
0x138a   :  { %v986_v57 = vsel %vm983_vm14, %v985_v55, %v981_v54 }
0x13c9   :  { %v991_v56 = vpop.permute.xlu2 %990 }
0x13ca   :  { %v993_v58 = vmul.f32 %v991_v56, %v986_v57 }
0x13cc   :  { %995 = vrot.lane.b32.xlu0 %v993_v58, %s1772_s28 }
0x143e   :  { %v996_v59 = vpop.permute.xlu0 %995 }
0x143f   :  { %v998_v60 = vadd.f32 %v996_v59, %v945_v46 }
0x1441   :  { %1548 = vtanh.f32 %v998_v60 }
0x1442   :  { %1550 = vpow2.f32 %v1450_v4 }
0x1447   :  { %v1549_v61 = vpop.eup %1548 }
0x1448   :  { %v1000_v62 = vsub.f32 %v939_v36, %v1549_v61  ;;  %v1551_v5 = vpop.eup %1550 }
0x1449   :  { %v710_v6 = vadd.f32 1.0, %v1551_v5 }
0x144a   :  { %1002 = vrot.lane.b32.xlu1 %v1000_v62, %s1774_s3 }
0x144b   :  { %1552 = vrcp.f32 %v710_v6  ;;  %v722_v16 = vand.u32 2147483648, %v710_v6  ;;  %vm716_vm0 = vweird.f32 %v710_v6  ;;  %v720_v17 = vand.u32 2147483647, %v710_v6 }
0x144d   :  { %v723_v20 = vor.u32 1.1754944e-38, %v722_v16  ;;  %vm721_vm2 = vcmp.eq.f32.partialorder %v720_v17, 8.507059e+37 }
0x1451   :  { %v1553_v7 = vpop.eup %1552 }
0x1452   :  { %728 = vrot.lane.b32.xlu1 %v726_v63, %s1772_s28  ;;  %v712_v8 = vmul.f32 %v1553_v7, %v710_v6  ;;  %vm717_vm15 = vweird.f32 %v1553_v7  ;;  %v1376_v63 = vld [vmem:[#allocation13 + $0x18] sm:$0xff]  ;;  %v2056_v6 = vld [vmem:[%s2106_s10] ss:$0 sm:$0xff]  ;;  %s1776_s10 = smov [#allocation15]  }
0x1453   :  { %vm718_vm1 = vmor %vm716_vm0, %vm717_vm15  ;;  %1399 = vmatpush.msra.mxu0 %v1376_v63  ;;  %s1416_s14 = sshll.u32 %s1776_s10, 4  ;;  %s1417_s14 = int_to_ptr.vmem [resolvable:$true] %s1416_s14 }
0x1454   :  { %v713_v11 = vsub.f32 1.0, %v712_v8 }
0x1456   :  { %v714_v12 = vmul.f32 %v1553_v7, %v713_v11 }
0x1458   :  { %v715_v14 = vadd.f32 %v1553_v7, %v714_v12 }
0x145a   :  { %v719_v18 = vsel %vm718_vm1, %v1553_v7, %v715_v14 }
0x145b   :  { %v724_v21 = vsel %vm721_vm2, %v723_v20, %v719_v18 }
0x14bc   :  { %v1003_v0 = vpop.permute.xlu1 %1002 }
0x14bd   :  { %v1005_v1 = vmul.f32 %v1003_v0, %v986_v57  ;;  %v1375_v0 = vld [vmem:[#allocation13 + $0x10] sm:$0xff] }
0x14be   :  { %1400 = vmatpush.msra.mxu0 %v1375_v0 }
0x14bf   :  { %1007 = vrot.lane.b32.xlu2 %v1005_v1, %s1775_s30  ;;  %v1374_v1 = vld [vmem:[#allocation13 + $0x8] sm:$0xff] }
0x14c0   :  { %1401 = vmatpush.msra.mxu0 %v1374_v1 }
0x14c4   :  { %v729_v19 = vpop.permute.xlu1 %728 }
0x14c5   :  { %v731_v22 = vmul.f32 %v729_v19, %v724_v21 }
0x1519   :  { %v1008_v13 = vpop.permute.xlu2 %1007 }
0x151a   :  { %v1010_v15 = vadd.f32 %v1549_v61, %v1008_v13 }
0x151c   :  { %1012 = vrot.lane.b32.xlu0 %v1010_v15, %s1772_s28 }
0x1524   :  { %733 = vrot.lane.b32.xlu0 %v731_v22, %s1772_s28 }
0x158e   :  { %v1013_v23 = vpop.permute.xlu0 %1012 }
0x158f   :  { %1015 = vst.msk [vmem:[#allocation2 + $0x4] sm:$0x3] %vm255_vm5, %v1013_v23  ;;  %1458 = vmatmul.msk.f32.vlgmr.msrb.gmra.mxu3 %vm181_vm6, %v1013_v23 }
0x1596   :  { %v734_v24 = vpop.permute.xlu0 %733 }
0x1597   :  { %v736_v25 = vadd.f32 %v734_v24, %v683_v2  ;;  %v1373_v2 = vld [vmem:[#allocation13] sm:$0xff] }
0x1598   :  { %1402 = vmatpush.msra.mxu0 %v1373_v2 }
0x1599   :  { %1554 = vtanh.f32 %v736_v25 }
0x159f   :  { %v1555_v28 = vpop.eup %1554 }
0x15a0   :  { %v738_v29 = vsub.f32 %v2011_v34, %v1555_v28 }
0x1612   :  { %v1036_v26 = vpop.f32.mrf.mxu3 }
0x1613   :  { %v1059_v27 = vadd.f32 %v1036_v26, %v1972_v47  ;;  %v1039_v31 = vadd.f32 %v1036_v26, %v1016_v30 }
0x1615   :  { %1061 = vrot.lane.b32.xlu2 %v1059_v27, %s1772_s28  ;;  %v1459_v32 = vmul.f32 -1.442695, %v1039_v31 }
0x1617   :  { %1556 = vpow2.f32 %v1459_v32 }
0x161d   :  { %740 = vrot.lane.b32.xlu2 %v738_v29, %s1774_s3  ;;  %v1557_v33 = vpop.eup %1556 }
0x161e   :  { %v1043_v35 = vadd.f32 1.0, %v1557_v33 }
0x1620   :  { %1558 = vrcp.f32 %v1043_v35  ;;  %v1055_v45 = vand.u32 2147483648, %v1043_v35  ;;  %vm1049_vm4 = vweird.f32 %v1043_v35  ;;  %v1053_v46 = vand.u32 2147483647, %v1043_v35 }
0x1622   :  { %v1056_v48 = vor.u32 1.1754944e-38, %v1055_v45  ;;  %vm1054_vm8 = vcmp.eq.f32.partialorder %v1053_v46, 8.507059e+37 }
0x1626   :  { %v1559_v36 = vpop.eup %1558 }
0x1627   :  { %v1045_v37 = vmul.f32 %v1559_v36, %v1043_v35  ;;  %vm1050_vm3 = vweird.f32 %v1559_v36 }
0x1628   :  { %vm1051_vm7 = vmor %vm1049_vm4, %vm1050_vm3 }
0x1629   :  { %v1046_v38 = vsub.f32 1.0, %v1045_v37 }
0x162b   :  { %v1047_v43 = vmul.f32 %v1559_v36, %v1046_v38 }
0x162d   :  { %v1048_v44 = vadd.f32 %v1559_v36, %v1047_v43 }
0x162f   :  { %v1052_v34 = vsel %vm1051_vm7, %v1559_v36, %v1048_v44 }
0x1630   :  { %v1057_v40 = vsel %vm1054_vm8, %v1056_v48, %v1052_v34 }
0x166f   :  { %v1062_v39 = vpop.permute.xlu2 %1061 }
0x1670   :  { %v1064_v49 = vmul.f32 %v1062_v39, %v1057_v40 }
0x1672   :  { %1066 = vrot.lane.b32.xlu1 %v1064_v49, %s1772_s28 }
0x1677   :  { %v741_v41 = vpop.permute.xlu2 %740 }
0x1678   :  { %v743_v9 = vmul.f32 %v741_v41, %v724_v21 }
0x167a   :  { %745 = vrot.lane.b32.xlu1 %v743_v9, %s1775_s30 }
0x16e4   :  { %v1067_v42 = vpop.permute.xlu1 %1066 }
0x16e5   :  { %v1069_v50 = vadd.f32 %v1067_v42, %v1016_v30 }
0x16e7   :  { %1560 = vtanh.f32 %v1069_v50 }
0x16ec   :  { %v746_v53 = vpop.permute.xlu1 %745 }
0x16ed   :  { %v1561_v51 = vpop.eup %1560  ;;  %v748_v54 = vadd.f32 %v1555_v28, %v746_v53 }
0x16ee   :  { %v1071_v52 = vsub.f32 %v1010_v15, %v1561_v51 }
0x16f0   :  { %1073 = vrot.lane.b32.xlu0 %v1071_v52, %s1774_s3 }
0x16f8   :  { %750 = vrot.lane.b32.xlu0 %v748_v54, %s1772_s28 }
0x1762   :  { %v1074_v55 = vpop.permute.xlu0 %1073 }
0x1763   :  { %v1076_v56 = vmul.f32 %v1074_v55, %v1057_v40 }
0x1765   :  { %1078 = vrot.lane.b32.xlu2 %v1076_v56, %s1775_s30 }
0x176a   :  { %v751_v57 = vpop.permute.xlu0 %750 }
0x176b   :  { %753 = vst.msk [vmem:[#allocation2 + $0xe] sm:$0x3] %vm255_vm5, %v751_v57 }
0x1772   :  { %v755_v58 = vld [vmem:[#allocation2 + $0x8] sm:$0xff] }
0x1773   :  { %1452 = vmatmul.msk.f32.gmra.mxu2 %vm181_vm6, %v755_v58 }
0x17bf   :  { %v1079_v59 = vpop.permute.xlu2 %1078 }
0x17c0   :  { %v1081_v60 = vadd.f32 %v1561_v51, %v1079_v59 }
0x17c2   :  { %1083 = vrot.lane.b32.xlu1 %v1081_v60, %s1772_s28 }
0x17f6   :  { %v790_v61 = vpop.f32.mrf.mxu2 }
0x17f7   :  { %v791_v62 = vadd.f32 %v1921_v10, %v790_v61 }
0x17f9   :  { %794 = vst [vmem:[#allocation3 + $0x8] sm:$0xff] %v791_v62 }
0x1800   :  { %v1087_v11 = vld [vmem:[#allocation3 + $0x8] sm:$0x3]  ;;  %v1158_v44 = vld [vmem:[#allocation3 + $0xa] sm:$0x3] }
0x1834   :  { %v1084_v3 = vpop.permute.xlu1 %1083 }
0x1835   :  { %1086 = vst.msk [vmem:[#allocation2 + $0x6] sm:$0x3] %vm255_vm5, %v1084_v3  ;;  %1460 = vmatmul.msk.f32.vlgmr.msrb.gmra.mxu0 %vm181_vm6, %v1084_v3  ;;  %v1229_v3 = vld [vmem:[#allocation3 + $0xc] sm:$0x3] }
0x183c   :  { %v1371_v4 = vld [vmem:[#allocation2] sm:$0xff] }
0x183d   :  { %1468 = vmatmul.msk.f32.vlgmr.msra.gmra.mxu0 %vm181_vm6, %v1371_v4 }
0x18b2   :  { %v1107_v5 = vpop.f32.mrf.mxu0 }
0x18b3   :  { %v1130_v10 = vadd.f32 %v1107_v5, %v1972_v47  ;;  %v1110_v12 = vadd.f32 %v1107_v5, %v1087_v11 }
0x18b5   :  { %1132 = vrot.lane.b32.xlu2 %v1130_v10, %s1772_s28  ;;  %v1461_v13 = vmul.f32 -1.442695, %v1110_v12 }
0x18b7   :  { %1562 = vpow2.f32 %v1461_v13 }
0x18ba   :  { %v1404_v7 = vpop.f32.mrf.mxu0 }
0x18bb   :  { %v1405_v8 = vadd.f32 %v2056_v6, %v1404_v7 }
0x18bd   :  { %1410 = vst [vmem:[#allocation15] sm:$0xff] %v1405_v8  ;;  %v1563_v14 = vpop.eup %1562 }
0x18be   :  { %v1114_v15 = vadd.f32 1.0, %v1563_v14 }
0x18c0   :  { %1564 = vrcp.f32 %v1114_v15  ;;  %v1126_v21 = vand.u32 2147483648, %v1114_v15  ;;  %vm1120_vm10 = vweird.f32 %v1114_v15  ;;  %v1124_v22 = vand.u32 2147483647, %v1114_v15 }
0x18c2   :  { %v1127_v24 = vor.u32 1.1754944e-38, %v1126_v21  ;;  %vm1125_vm12 = vcmp.eq.f32.partialorder %v1124_v22, 8.507059e+37 }
0x18c6   :  { %v1565_v16 = vpop.eup %1564 }
0x18c7   :  { %v1116_v17 = vmul.f32 %v1565_v16, %v1114_v15  ;;  %vm1121_vm9 = vweird.f32 %v1565_v16 }
0x18c8   :  { %vm1122_vm11 = vmor %vm1120_vm10, %vm1121_vm9 }
0x18c9   :  { %v1117_v18 = vsub.f32 1.0, %v1116_v17 }
0x18cb   :  { %v1118_v19 = vmul.f32 %v1565_v16, %v1117_v18 }
0x18cd   :  { %v1119_v20 = vadd.f32 %v1565_v16, %v1118_v19 }
0x18cf   :  { %v1123_v23 = vsel %vm1122_vm11, %v1565_v16, %v1119_v20 }
0x18d0   :  { %v1128_v26 = vsel %vm1125_vm12, %v1127_v24, %v1123_v23 }
0x190f   :  { %v1133_v25 = vpop.permute.xlu2 %1132 }
0x1910   :  { %v1135_v27 = vmul.f32 %v1133_v25, %v1128_v26 }
0x1912   :  { %1137 = vrot.lane.b32.xlu0 %v1135_v27, %s1772_s28 }
0x1984   :  { %v1138_v28 = vpop.permute.xlu0 %1137 }
0x1985   :  { %v1140_v29 = vadd.f32 %v1138_v28, %v1087_v11 }
0x1987   :  { %1566 = vtanh.f32 %v1140_v29 }
0x198d   :  { %v1567_v30 = vpop.eup %1566 }
0x198e   :  { %v1142_v31 = vsub.f32 %v1081_v60, %v1567_v30 }
0x1990   :  { %1144 = vrot.lane.b32.xlu1 %v1142_v31, %s1774_s3 }
0x1a02   :  { %v1145_v32 = vpop.permute.xlu1 %1144 }
0x1a03   :  { %v1147_v33 = vmul.f32 %v1145_v32, %v1128_v26 }
0x1a05   :  { %1149 = vrot.lane.b32.xlu2 %v1147_v33, %s1775_s30  ;;  %v1300_v33 = vld [vmem:[#allocation3 + $0xe] sm:$0x3] }
0x1a5f   :  { %v1150_v35 = vpop.permute.xlu2 %1149 }
0x1a60   :  { %v1152_v36 = vadd.f32 %v1567_v30, %v1150_v35 }
0x1a62   :  { %1154 = vrot.lane.b32.xlu0 %v1152_v36, %s1772_s28 }
0x1ad4   :  { %v1155_v37 = vpop.permute.xlu0 %1154 }
0x1ad5   :  { %1157 = vst.msk [vmem:[#allocation2 + $0x8] sm:$0x3] %vm255_vm5, %v1155_v37  ;;  %1462 = vmatmul.msk.f32.vlgmr.msrb.gmra.mxu1 %vm181_vm6, %v1155_v37 }
0x1b52   :  { %v1178_v38 = vpop.f32.mrf.mxu1 }
0x1b53   :  { %v1201_v43 = vadd.f32 %v1178_v38, %v1972_v47  ;;  %v1181_v45 = vadd.f32 %v1178_v38, %v1158_v44 }
0x1b55   :  { %1203 = vrot.lane.b32.xlu1 %v1201_v43, %s1772_s28  ;;  %v1463_v46 = vmul.f32 -1.442695, %v1181_v45 }
0x1b57   :  { %1568 = vpow2.f32 %v1463_v46 }
0x1b5d   :  { %v1569_v34 = vpop.eup %1568 }
0x1b5e   :  { %v1185_v48 = vadd.f32 1.0, %v1569_v34 }
0x1b60   :  { %1570 = vrcp.f32 %v1185_v48  ;;  %v1197_v42 = vand.u32 2147483648, %v1185_v48  ;;  %vm1191_vm14 = vweird.f32 %v1185_v48  ;;  %v1195_v50 = vand.u32 2147483647, %v1185_v48 }
0x1b62   :  { %v1198_v52 = vor.u32 1.1754944e-38, %v1197_v42  ;;  %vm1196_vm0 = vcmp.eq.f32.partialorder %v1195_v50, 8.507059e+37 }
0x1b66   :  { %v1571_v39 = vpop.eup %1570 }
0x1b67   :  { %v1187_v40 = vmul.f32 %v1571_v39, %v1185_v48  ;;  %vm1192_vm13 = vweird.f32 %v1571_v39 }
0x1b68   :  { %vm1193_vm15 = vmor %vm1191_vm14, %vm1192_vm13 }
0x1b69   :  { %v1188_v49 = vsub.f32 1.0, %v1187_v40 }
0x1b6b   :  { %v1189_v41 = vmul.f32 %v1571_v39, %v1188_v49 }
0x1b6d   :  { %v1190_v9 = vadd.f32 %v1571_v39, %v1189_v41 }
0x1b6f   :  { %v1194_v51 = vsel %vm1193_vm15, %v1571_v39, %v1190_v9 }
0x1b70   :  { %v1199_v54 = vsel %vm1196_vm0, %v1198_v52, %v1194_v51 }
0x1bc7   :  { %v1204_v53 = vpop.permute.xlu1 %1203 }
0x1bc8   :  { %v1206_v55 = vmul.f32 %v1204_v53, %v1199_v54 }
0x1bca   :  { %1208 = vrot.lane.b32.xlu2 %v1206_v55, %s1772_s28 }
0x1c24   :  { %v1209_v56 = vpop.permute.xlu2 %1208 }
0x1c25   :  { %v1211_v57 = vadd.f32 %v1209_v56, %v1158_v44 }
0x1c27   :  { %1572 = vtanh.f32 %v1211_v57 }
0x1c2d   :  { %v1573_v58 = vpop.eup %1572 }
0x1c2e   :  { %v1213_v59 = vsub.f32 %v1152_v36, %v1573_v58 }
0x1c30   :  { %1215 = vrot.lane.b32.xlu0 %v1213_v59, %s1774_s3 }
0x1ca2   :  { %v1216_v60 = vpop.permute.xlu0 %1215 }
0x1ca3   :  { %v1218_v61 = vmul.f32 %v1216_v60, %v1199_v54 }
0x1ca5   :  { %1220 = vrot.lane.b32.xlu1 %v1218_v61, %s1775_s30 }
0x1d17   :  { %v1221_v62 = vpop.permute.xlu1 %1220 }
0x1d18   :  { %v1223_v63 = vadd.f32 %v1573_v58, %v1221_v62 }
0x1d1a   :  { %1225 = vrot.lane.b32.xlu2 %v1223_v63, %s1772_s28 }
0x1d74   :  { %v1226_v0 = vpop.permute.xlu2 %1225 }
0x1d75   :  { %1228 = vst.msk [vmem:[#allocation2 + $0xa] sm:$0x3] %vm255_vm5, %v1226_v0  ;;  %1464 = vmatmul.msk.f32.vlgmr.msrb.gmra.mxu2 %vm181_vm6, %v1226_v0 }
0x1df8   :  { %v1249_v1 = vpop.f32.mrf.mxu2 }
0x1df9   :  { %v1272_v2 = vadd.f32 %v1249_v1, %v1972_v47  ;;  %v1252_v4 = vadd.f32 %v1249_v1, %v1229_v3 }
0x1dfb   :  { %1274 = vrot.lane.b32.xlu0 %v1272_v2, %s1772_s28  ;;  %v1465_v5 = vmul.f32 -1.442695, %v1252_v4 }
0x1dfd   :  { %1574 = vpow2.f32 %v1465_v5 }
0x1e03   :  { %v1575_v10 = vpop.eup %1574 }
0x1e04   :  { %v1256_v7 = vadd.f32 1.0, %v1575_v10 }
0x1e06   :  { %1576 = vrcp.f32 %v1256_v7  ;;  %v1268_v15 = vand.u32 2147483648, %v1256_v7  ;;  %vm1262_vm2 = vweird.f32 %v1256_v7  ;;  %v1266_v16 = vand.u32 2147483647, %v1256_v7 }
0x1e08   :  { %v1269_v18 = vor.u32 1.1754944e-38, %v1268_v15  ;;  %vm1267_vm4 = vcmp.eq.f32.partialorder %v1266_v16, 8.507059e+37 }
0x1e0c   :  { %v1577_v8 = vpop.eup %1576 }
0x1e0d   :  { %v1258_v11 = vmul.f32 %v1577_v8, %v1256_v7  ;;  %vm1263_vm1 = vweird.f32 %v1577_v8 }
0x1e0e   :  { %vm1264_vm3 = vmor %vm1262_vm2, %vm1263_vm1 }
0x1e0f   :  { %v1259_v12 = vsub.f32 1.0, %v1258_v11 }
0x1e11   :  { %v1260_v13 = vmul.f32 %v1577_v8, %v1259_v12 }
0x1e13   :  { %v1261_v14 = vadd.f32 %v1577_v8, %v1260_v13 }
0x1e15   :  { %v1265_v17 = vsel %vm1264_vm3, %v1577_v8, %v1261_v14 }
0x1e16   :  { %v1270_v20 = vsel %vm1267_vm4, %v1269_v18, %v1265_v17 }
0x1e6d   :  { %v1275_v19 = vpop.permute.xlu0 %1274 }
0x1e6e   :  { %v1277_v21 = vmul.f32 %v1275_v19, %v1270_v20 }
0x1e70   :  { %1279 = vrot.lane.b32.xlu1 %v1277_v21, %s1772_s28 }
0x1ee2   :  { %v1280_v22 = vpop.permute.xlu1 %1279 }
0x1ee3   :  { %v1282_v23 = vadd.f32 %v1280_v22, %v1229_v3 }
0x1ee5   :  { %1578 = vtanh.f32 %v1282_v23 }
0x1eeb   :  { %v1579_v24 = vpop.eup %1578 }
0x1eec   :  { %v1284_v25 = vsub.f32 %v1223_v63, %v1579_v24 }
0x1eee   :  { %1286 = vrot.lane.b32.xlu2 %v1284_v25, %s1774_s3 }
0x1f48   :  { %v1287_v26 = vpop.permute.xlu2 %1286 }
0x1f49   :  { %v1289_v27 = vmul.f32 %v1287_v26, %v1270_v20 }
0x1f4b   :  { %1291 = vrot.lane.b32.xlu0 %v1289_v27, %s1775_s30 }
0x1fbd   :  { %v1292_v28 = vpop.permute.xlu0 %1291 }
0x1fbe   :  { %v1294_v29 = vadd.f32 %v1579_v24, %v1292_v28 }
0x1fc0   :  { %1296 = vrot.lane.b32.xlu1 %v1294_v29, %s1772_s28 }
0x2032   :  { %v1297_v30 = vpop.permute.xlu1 %1296 }
0x2033   :  { %1299 = vst.msk [vmem:[#allocation2 + $0xc] sm:$0x3] %vm255_vm5, %v1297_v30  ;;  %1466 = vmatmul.msk.f32.vlgmr.msra.gmra.mxu3 %vm181_vm6, %v1297_v30 }
0x20b6   :  { %v1320_v31 = vpop.f32.mrf.mxu3 }
0x20b7   :  { %v1343_v32 = vadd.f32 %v1320_v31, %v1972_v47  ;;  %v1323_v35 = vadd.f32 %v1320_v31, %v1300_v33 }
0x20b9   :  { %1345 = vrot.lane.b32.xlu2 %v1343_v32, %s1772_s28  ;;  %v1467_v36 = vmul.f32 -1.442695, %v1323_v35 }
0x20bb   :  { %1580 = vpow2.f32 %v1467_v36 }
0x20c1   :  { %v1581_v37 = vpop.eup %1580 }
0x20c2   :  { %v1327_v38 = vadd.f32 1.0, %v1581_v37 }
0x20c4   :  { %1582 = vrcp.f32 %v1327_v38  ;;  %v1339_v48 = vand.u32 2147483648, %v1327_v38  ;;  %vm1333_vm8 = vweird.f32 %v1327_v38  ;;  %v1337_v39 = vand.u32 2147483647, %v1327_v38 }
0x20c6   :  { %v1340_v40 = vor.u32 1.1754944e-38, %v1339_v48  ;;  %vm1338_vm10 = vcmp.eq.f32.partialorder %v1337_v39, 8.507059e+37 }
0x20ca   :  { %v1583_v43 = vpop.eup %1582 }
0x20cb   :  { %v1329_v44 = vmul.f32 %v1583_v43, %v1327_v38  ;;  %vm1334_vm7 = vweird.f32 %v1583_v43 }
0x20cc   :  { %vm1335_vm9 = vmor %vm1333_vm8, %vm1334_vm7 }
0x20cd   :  { %v1330_v45 = vsub.f32 1.0, %v1329_v44 }
0x20cf   :  { %v1331_v46 = vmul.f32 %v1583_v43, %v1330_v45 }
0x20d1   :  { %v1332_v34 = vadd.f32 %v1583_v43, %v1331_v46 }
0x20d3   :  { %v1336_v47 = vsel %vm1335_vm9, %v1583_v43, %v1332_v34 }
0x20d4   :  { %v1341_v41 = vsel %vm1338_vm10, %v1340_v40, %v1336_v47 }
0x2113   :  { %v1346_v49 = vpop.permute.xlu2 %1345 }
0x2114   :  { %v1348_v9 = vmul.f32 %v1346_v49, %v1341_v41 }
0x2116   :  { %1350 = vrot.lane.b32.xlu0 %v1348_v9, %s1772_s28 }
0x2188   :  { %v1351_v42 = vpop.permute.xlu0 %1350 }
0x2189   :  { %v1353_v50 = vadd.f32 %v1351_v42, %v1300_v33 }
0x218b   :  { %1584 = vtanh.f32 %v1353_v50 }
0x2191   :  { %v1585_v51 = vpop.eup %1584 }
0x2192   :  { %v1355_v52 = vsub.f32 %v1294_v29, %v1585_v51 }
0x2194   :  { %1357 = vrot.lane.b32.xlu1 %v1355_v52, %s1774_s3 }
0x2206   :  { %v1358_v53 = vpop.permute.xlu1 %1357 }
0x2207   :  { %v1360_v54 = vmul.f32 %v1358_v53, %v1341_v41 }
0x2209   :  { %1362 = vrot.lane.b32.xlu2 %v1360_v54, %s1775_s30 }
0x2263   :  { %v1363_v55 = vpop.permute.xlu2 %1362 }
0x2264   :  { %v1365_v56 = vadd.f32 %v1585_v51, %v1363_v55 }
0x2266   :  { %1367 = vrot.lane.b32.xlu0 %v1365_v56, %s1772_s28 }
0x22d8   :  { %v1368_v57 = vpop.permute.xlu0 %1367 }
0x22d9   :  { %1370 = vst.msk [vmem:[#allocation2 + $0xe] sm:$0x3] %vm255_vm5, %v1368_v57 }
0x22e0   :  { %v1372_v58 = vld [vmem:[#allocation2 + $0x8] sm:$0xff] }
0x22e1   :  { %1469 = vmatmul.msk.f32.gmra.mxu0 %vm181_vm6, %v1372_v58 }
0x235e   :  { %v1407_v59 = vpop.f32.mrf.mxu0 }
0x235f   :  { %v1408_v60 = vadd.f32 %v2056_v6, %v1407_v59 }
0x2361   :  { %1411 = vst [vmem:[#allocation15 + $0x8] sm:$0xff] %v1408_v60 }
0x2362   :  { %1424 = dma.vmem_to_hbm [thread:$0]  %s1417_s14, 256, %s1419_s0, [#allocation6], %s1765_s25, %s1765_s25, %s1766_s26  }
0x2363   :  { %1762 = dma.done.wait [#allocation6], 256  }
0x2364   :  { %1763 = vsyncadd [#allocation6], 4294967040 }
0x2365   :  { %1429 = vsyncpa [#allocation5], 1 }
0x2366   :  { %1430 = vsyncpa [#allocation8], 1 }
0x2367   :  { %1431 = vsyncpa [#allocation11], 1 }
0x2368   :  { %1432 = vsyncpa [#allocation14], 1 }
0x2369   :  { %1433 = vsyncpa [#allocation6], 1 }

</bundles_post_ra>
